<compile_context>
chip_gen: v7x
topology: tpu7x:2x2x1
jax: 0.10.0
libtpu: 0.0.40
codegen_flags: <defaults>
</compile_context>

<pallas_src>
import functools

import jax
import jax.numpy as jnp
from jax import lax
from jax.experimental import pallas as pl
from jax.experimental.pallas import tpu as pltpu

BN_EPS = 1e-5


def _round_up(x, m):
    return (x + m - 1) // m * m


# --------------------------------------------------------------------------
# Stage 1: h = relu(gn @ W_dense + b_dense), tiled over (batch, K), plus
# per-batch-tile sum(h) and sum(h*h) for full-batch BatchNorm statistics.
# --------------------------------------------------------------------------
def _stage1_kernel(gn_ref, wd_ref, bd_ref,          # inputs
                   h_ref, sum_ref, ssq_ref,         # outputs
                   acc_ref,                         # scratch
                   *, tb, batch, mask_rows):
    k = pl.program_id(1)

    @pl.when(k == 0)
    def _init():
        acc_ref[...] = jnp.zeros_like(acc_ref)

    # bf16 operands on the MXU, f32 accumulation.
    acc_ref[...] += jnp.dot(gn_ref[...], wd_ref[...],
                            preferred_element_type=jnp.float32)

    @pl.when(k == pl.num_programs(1) - 1)
    def _finalize():
        h = jnp.maximum(acc_ref[...] + bd_ref[...], 0.0)
        h_ref[...] = h

        if mask_rows:
            rows = pl.program_id(0) * tb + lax.broadcasted_iota(
                jnp.int32, (tb, 1), 0)
            h_stats = jnp.where(rows < batch, h, 0.0)
        else:
            h_stats = h

        s = jnp.sum(h_stats, axis=0, keepdims=True)           # (1, E)
        sq = jnp.sum(h_stats * h_stats, axis=0, keepdims=True)  # (1, E)
        sum_ref[...] = s[None]
        ssq_ref[...] = sq[None]


# --------------------------------------------------------------------------
# Stage 2: out = (h * scale + shift) -> fc1 -> ReLU -> fc2, tiled over batch.
# --------------------------------------------------------------------------
def _stage2_kernel(h_ref, scale_ref, shift_ref,
                   w1_ref, b1_ref, w2_ref, b2_ref,
                   out_ref):
    # Fused BatchNorm (scale/shift precomputed from full-batch stats), f32.
    hn = h_ref[...] * scale_ref[...] + shift_ref[...]

    h1 = jnp.dot(hn.astype(jnp.bfloat16), w1_ref[...],
                 preferred_element_type=jnp.float32)
    h1 = jnp.maximum(h1 + b1_ref[...], 0.0)

    # Dropout(p=0) is the identity.
    out = jnp.dot(h1.astype(jnp.bfloat16), w2_ref[...],
                  preferred_element_type=jnp.float32)
    out_ref[...] = (out + b2_ref[...]).astype(out_ref.dtype)


# --------------------------------------------------------------------------
# Wrapper
# --------------------------------------------------------------------------
def cell_encoder(gn, params, *, tb=256, tk=512):
    """gn: (B, num_genes) f32.  params: dict of weights (see init_params)."""
    f32, bf16 = jnp.float32, jnp.bfloat16
    B, G = gn.shape
    E = params["w_dense"].shape[1]
    H = params["w1"].shape[1]
    O = params["w2"].shape[1]

    # Lane-dense feature dims, sublane-aligned batch tile, K tile.
    E_pad = _round_up(E, 128)
    H_pad = _round_up(H, 128)
    O_pad = _round_up(O, 128)
    tb = _round_up(min(tb, _round_up(B, 8)), 8)
    tk = _round_up(min(tk, _round_up(G, 128)), 128)
    B_pad = _round_up(B, tb)
    G_pad = _round_up(G, tk)
    n_bt = B_pad // tb
    n_kt = G_pad // tk

    # Zero-pad and pre-cast matmul operands to bf16 (biases / BN params stay f32).
    gn_p = jnp.pad(gn, ((0, B_pad - B), (0, G_pad - G))).astype(bf16)
    wd_p = jnp.pad(params["w_dense"], ((0, G_pad - G), (0, E_pad - E))).astype(bf16)
    bd_p = jnp.pad(params["b_dense"], ((0, 0), (0, E_pad - E))).astype(f32)
    gamma_p = jnp.pad(params["gamma"], ((0, 0), (0, E_pad - E))).astype(f32)
    beta_p = jnp.pad(params["beta"], ((0, 0), (0, E_pad - E))).astype(f32)
    w1_p = jnp.pad(params["w1"], ((0, E_pad - E), (0, H_pad - H))).astype(bf16)
    b1_p = jnp.pad(params["b1"], ((0, 0), (0, H_pad - H))).astype(f32)
    w2_p = jnp.pad(params["w2"], ((0, H_pad - H), (0, O_pad - O))).astype(bf16)
    b2_p = jnp.pad(params["b2"], ((0, 0), (0, O_pad - O))).astype(f32)

    vmem_limit = 64 * 1024 * 1024

    # ---------------- Stage 1 ----------------
    h, psum, pssq = pl.pallas_call(
        functools.partial(_stage1_kernel, tb=tb, batch=B,
                          mask_rows=(B_pad != B)),
        out_shape=(
            jax.ShapeDtypeStruct((B_pad, E_pad), f32),     # h = relu(dense)
            jax.ShapeDtypeStruct((n_bt, 1, E_pad), f32),   # per-tile sum
            jax.ShapeDtypeStruct((n_bt, 1, E_pad), f32),   # per-tile sum of sq
        ),
        grid=(n_bt, n_kt),
        in_specs=[
            pl.BlockSpec((tb, tk), lambda i, k: (i, k)),
            pl.BlockSpec((tk, E_pad), lambda i, k: (k, 0)),
            pl.BlockSpec((1, E_pad), lambda i, k: (0, 0)),
        ],
        out_specs=(
            pl.BlockSpec((tb, E_pad), lambda i, k: (i, 0)),
            pl.BlockSpec((1, 1, E_pad), lambda i, k: (i, 0, 0)),
            pl.BlockSpec((1, 1, E_pad), lambda i, k: (i, 0, 0)),
        ),
        scratch_shapes=[pltpu.VMEM((tb, E_pad), f32)],
        compiler_params=pltpu.CompilerParams(
            dimension_semantics=("parallel", "arbitrary"),
            vmem_limit_bytes=vmem_limit,
        ),
        cost_estimate=pl.CostEstimate(
            flops=2 * B_pad * G_pad * E_pad,
            transcendentals=0,
            bytes_accessed=(B_pad * G_pad * 2 + n_bt * G_pad * E_pad * 2
                            + B_pad * E_pad * 4),
        ),
    )(gn_p, wd_p, bd_p)

    # ------- Full-batch BatchNorm stats -> fused scale/shift (tiny, f32) -------
    total = jnp.sum(psum, axis=0)                 # (1, E_pad)
    total_sq = jnp.sum(pssq, axis=0)              # (1, E_pad)
    mean = total / B
    var = jnp.maximum(total_sq / B - mean * mean, 0.0)   # biased variance
    inv_std = lax.rsqrt(var + BN_EPS)
    scale = gamma_p * inv_std
    shift = beta_p - mean * scale

    # ---------------- Stage 2 ----------------
    out = pl.pallas_call(
        _stage2_kernel,
        out_shape=jax.ShapeDtypeStruct((B_pad, O_pad), f32),
        grid=(n_bt,),
        in_specs=[
            pl.BlockSpec((tb, E_pad), lambda i: (i, 0)),
            pl.BlockSpec((1, E_pad), lambda i: (0, 0)),
            pl.BlockSpec((1, E_pad), lambda i: (0, 0)),
            pl.BlockSpec((E_pad, H_pad), lambda i: (0, 0)),
            pl.BlockSpec((1, H_pad), lambda i: (0, 0)),
            pl.BlockSpec((H_pad, O_pad), lambda i: (0, 0)),
            pl.BlockSpec((1, O_pad), lambda i: (0, 0)),
        ],
        out_specs=pl.BlockSpec((tb, O_pad), lambda i: (i, 0)),
        compiler_params=pltpu.CompilerParams(
            dimension_semantics=("parallel",),
            vmem_limit_bytes=vmem_limit,
        ),
        cost_estimate=pl.CostEstimate(
            flops=2 * B_pad * (E_pad * H_pad + H_pad * O_pad),
            transcendentals=0,
            bytes_accessed=(B_pad * E_pad * 4 + E_pad * H_pad * 2
                            + H_pad * O_pad * 2 + B_pad * O_pad * 4),
        ),
    )(h, scale, shift, w1_p, b1_p, w2_p, b2_p)

    return out[:B, :O]


# --------------------------------------------------------------------------
# Parameters + references
# --------------------------------------------------------------------------
def init_params(key, num_genes, gene_embed_size, out_size):
    """Deterministic synthetic init (shapes match the torch module)."""
    hidden = gene_embed_size // 2
    ks = jax.random.split(key, 6)

    def lin(k, fan_in, fan_out):
        bound = 1.0 / jnp.sqrt(jnp.float32(fan_in))
        kw, kb = jax.random.split(k)
        w = jax.random.uniform(kw, (fan_in, fan_out), jnp.float32, -bound, bound)
        b = jax.random.uniform(kb, (1, fan_out), jnp.float32, -bound, bound)
        return w, b

    w_dense, b_dense = lin(ks[0], num_genes, gene_embed_size)
    w1, b1 = lin(ks[1], gene_embed_size, hidden)
    w2, b2 = lin(ks[2], hidden, out_size)
    gamma = 1.0 + 0.1 * jax.random.normal(ks[3], (1, gene_embed_size), jnp.float32)
    beta = 0.1 * jax.random.normal(ks[4], (1, gene_embed_size), jnp.float32)
    return {
        "w_dense": w_dense, "b_dense": b_dense,
        "gamma": gamma, "beta": beta,
        "w1": w1, "b1": b1,
        "w2": w2, "b2": b2,
    }


def cell_encoder_ref(gn, p):
    """Pure-f32 reference of the torch forward (training-mode BN)."""
    h = jnp.maximum(gn @ p["w_dense"] + p["b_dense"], 0.0)
    mean = jnp.mean(h, axis=0, keepdims=True)
    var = jnp.mean((h - mean) ** 2, axis=0, keepdims=True)
    hn = (h - mean) / jnp.sqrt(var + BN_EPS) * p["gamma"] + p["beta"]
    h1 = jnp.maximum(hn @ p["w1"] + p["b1"], 0.0)
    return h1 @ p["w2"] + p["b2"]


def cell_encoder_ref_mixed(gn, p):
    """Reference with the same bf16-operand / f32-accumulate math as the kernel."""
    bf16 = jnp.bfloat16
    h = jnp.dot(gn.astype(bf16), p["w_dense"].astype(bf16),
                preferred_element_type=jnp.float32) + p["b_dense"]
    h = jnp.maximum(h, 0.0)
    mean = jnp.mean(h, axis=0, keepdims=True)
    var = jnp.maximum(jnp.mean(h * h, axis=0, keepdims=True) - mean * mean, 0.0)
    inv_std = lax.rsqrt(var + BN_EPS)
    scale = p["gamma"] * inv_std
    shift = p["beta"] - mean * scale
    hn = h * scale + shift
    h1 = jnp.dot(hn.astype(bf16), p["w1"].astype(bf16),
                 preferred_element_type=jnp.float32) + p["b1"]
    h1 = jnp.maximum(h1, 0.0)
    return jnp.dot(h1.astype(bf16), p["w2"].astype(bf16),
                   preferred_element_type=jnp.float32) + p["b2"]


if __name__ == "__main__":
    # Small shapes consistent with the module defaults:
    # batch=64, num_genes=256, gene_embed_size=256 (hidden=128), out_size=64.
    # Tiles tb=32, tk=128 exercise 2 batch tiles x 2 K tiles.
    B, NUM_GENES, EMBED, OUT = 64, 256, 256, 64

    key = jax.random.PRNGKey(0)
    k_x, k_p = jax.random.split(key)
    gn = jax.random.normal(k_x, (B, NUM_GENES), jnp.float32)
    params = init_params(k_p, NUM_GENES, EMBED, OUT)

    encoder = jax.jit(functools.partial(cell_encoder, tb=32, tk=128))
    out = jax.block_until_ready(encoder(gn, params))

    assert out.shape == (B, OUT)

    # Tight check vs a reference using identical mixed-precision math.
    ref_mixed = cell_encoder_ref_mixed(gn, params)
    assert jnp.allclose(out, ref_mixed, atol=2e-3, rtol=2e-3), \
        "mismatch vs mixed-precision reference"

    # Loose sanity check vs the pure-f32 reference (bf16 MXU operands).
    ref_f32 = cell_encoder_ref(gn, params)
    assert jnp.allclose(out, ref_f32, atol=1e-1, rtol=5e-2), \
        "mismatch vs f32 reference"

    print("KERNEL_OK")
</pallas_src>

<mosaic_0001>
module attributes {stable_mosaic.version = 11 : i64} {
  func.func @_stage1_kernel(%arg0: i32, %arg1: i32, %arg2: memref<32x128xbf16, #tpu.memory_space<vmem>>, %arg3: memref<128x256xbf16, #tpu.memory_space<vmem>>, %arg4: memref<1x256xf32, #tpu.memory_space<vmem>>, %arg5: memref<32x256xf32, #tpu.memory_space<vmem>>, %arg6: memref<1x1x256xf32, #tpu.memory_space<vmem>>, %arg7: memref<1x1x256xf32, #tpu.memory_space<vmem>>, %arg8: memref<32x256xf32, #tpu.memory_space<vmem>>) attributes {dimension_semantics = [#tpu.dimension_semantics<parallel>, #tpu.dimension_semantics<arbitrary>], iteration_bounds = array<i64: 2, 2>, scalar_prefetch = 0 : i64, scratch_operands = 1 : i64, tpu.core_type = #tpu.core_type<tc>, window_params = [{transform_indices = @transform_0, window_bounds = array<i64: 32, 128>}, {transform_indices = @transform_1, window_bounds = array<i64: 128, 256>}, {pipeline_mode = #tpu.pipeline_mode<synchronous>, transform_indices = @transform_2, window_bounds = array<i64: 1, 256>}, {transform_indices = @transform_3, window_bounds = array<i64: 32, 256>}, {transform_indices = @transform_4, window_bounds = array<i64: 1, 1, 256>}, {transform_indices = @transform_5, window_bounds = array<i64: 1, 1, 256>}]} {
    %c0_i32 = arith.constant 0 : i32
    %0 = arith.cmpi eq, %arg1, %c0_i32 : i32
    %1 = arith.extui %0 : i1 to i32
    %c0_i32_0 = arith.constant 0 : i32
    %2 = arith.cmpi ne, %1, %c0_i32_0 : i32
    scf.if %2 {
      %cst_9 = arith.constant 0.000000e+00 : f32
      %12 = vector.broadcast %cst_9 : f32 to vector<32x256xf32>
      %c0_10 = arith.constant 0 : index
      %c0_11 = arith.constant 0 : index
      %13 = vector.load %arg8[%c0_10, %c0_11] : memref<32x256xf32, #tpu.memory_space<vmem>>, vector<32x256xf32>
      tpu.vector_store %arg8[%c0_10, %c0_11], %12 {strides = array<i32>} : memref<32x256xf32, #tpu.memory_space<vmem>>, vector<32x256xf32>,
    } else {
    }
    %c0 = arith.constant 0 : index
    %c0_1 = arith.constant 0 : index
    %3 = vector.load %arg8[%c0, %c0_1] : memref<32x256xf32, #tpu.memory_space<vmem>>, vector<32x256xf32>
    %c0_2 = arith.constant 0 : index
    %c0_3 = arith.constant 0 : index
    %4 = vector.load %arg2[%c0_2, %c0_3] : memref<32x128xbf16, #tpu.memory_space<vmem>>, vector<32x128xbf16>
    %c0_4 = arith.constant 0 : index
    %c0_5 = arith.constant 0 : index
    %5 = vector.load %arg3[%c0_4, %c0_5] : memref<128x256xbf16, #tpu.memory_space<vmem>>, vector<128x256xbf16>
    %cst = arith.constant dense<0.000000e+00> : vector<32x256xf32>
    %6 = tpu.matmul %4, %5, %cst {dimension_numbers = #tpu.dot_dimension_numbers<[1], [0], [0], [1], [0, 0, 1, 1], [], []>} : vector<32x128xbf16>, vector<128x256xbf16>, vector<32x256xf32> -> vector<32x256xf32>
    %7 = arith.addf %3, %6 : vector<32x256xf32>
    %c0_6 = arith.constant 0 : index
    %c0_7 = arith.constant 0 : index
    %8 = vector.load %arg8[%c0_6, %c0_7] : memref<32x256xf32, #tpu.memory_space<vmem>>, vector<32x256xf32>
    tpu.vector_store %arg8[%c0_6, %c0_7], %7 {strides = array<i32>} : memref<32x256xf32, #tpu.memory_space<vmem>>, vector<32x256xf32>,
    %c1_i32 = arith.constant 1 : i32
    %9 = arith.cmpi eq, %arg1, %c1_i32 : i32
    %10 = arith.extui %9 : i1 to i32
    %c0_i32_8 = arith.constant 0 : i32
    %11 = arith.cmpi ne, %10, %c0_i32_8 : i32
    scf.if %11 {
      %c0_9 = arith.constant 0 : index
      %c0_10 = arith.constant 0 : index
      %12 = vector.load %arg8[%c0_9, %c0_10] : memref<32x256xf32, #tpu.memory_space<vmem>>, vector<32x256xf32>
      %c0_11 = arith.constant 0 : index
      %c0_12 = arith.constant 0 : index
      %13 = vector.load %arg4[%c0_11, %c0_12] : memref<1x256xf32, #tpu.memory_space<vmem>>, vector<1x256xf32>
      %14 = vector.broadcast %13 : vector<1x256xf32> to vector<32x256xf32>
      %15 = arith.addf %12, %14 : vector<32x256xf32>
      %cst_13 = arith.constant 0.000000e+00 : f32
      %16 = vector.broadcast %cst_13 : f32 to vector<32x256xf32>
      %17 = arith.maximumf %15, %16 : vector<32x256xf32>
      %c0_14 = arith.constant 0 : index
      %c0_15 = arith.constant 0 : index
      %18 = vector.load %arg5[%c0_14, %c0_15] : memref<32x256xf32, #tpu.memory_space<vmem>>, vector<32x256xf32>
      tpu.vector_store %arg5[%c0_14, %c0_15], %17 {strides = array<i32>} : memref<32x256xf32, #tpu.memory_space<vmem>>, vector<32x256xf32>,
      %cst_16 = arith.constant dense<0.000000e+00> : vector<256xf32>
      %19 = vector.multi_reduction <add>, %17, %cst_16 [0] : vector<32x256xf32> to vector<256xf32>
      %20 = vector.shape_cast %19 : vector<256xf32> to vector<1x256xf32>
      %21 = arith.mulf %17, %17 : vector<32x256xf32>
      %cst_17 = arith.constant dense<0.000000e+00> : vector<256xf32>
      %22 = vector.multi_reduction <add>, %21, %cst_17 [0] : vector<32x256xf32> to vector<256xf32>
      %23 = vector.shape_cast %22 : vector<256xf32> to vector<1x256xf32>
      %24 = vector.shape_cast %20 : vector<1x256xf32> to vector<1x1x256xf32>
      %c0_18 = arith.constant 0 : index
      %c0_19 = arith.constant 0 : index
      %c0_20 = arith.constant 0 : index
      %25 = vector.load %arg6[%c0_18, %c0_19, %c0_20] : memref<1x1x256xf32, #tpu.memory_space<vmem>>, vector<1x1x256xf32>
      tpu.vector_store %arg6[%c0_18, %c0_19, %c0_20], %24 {strides = array<i32>} : memref<1x1x256xf32, #tpu.memory_space<vmem>>, vector<1x1x256xf32>,
      %26 = vector.shape_cast %23 : vector<1x256xf32> to vector<1x1x256xf32>
      %c0_21 = arith.constant 0 : index
      %c0_22 = arith.constant 0 : index
      %c0_23 = arith.constant 0 : index
      %27 = vector.load %arg7[%c0_21, %c0_22, %c0_23] : memref<1x1x256xf32, #tpu.memory_space<vmem>>, vector<1x1x256xf32>
      tpu.vector_store %arg7[%c0_21, %c0_22, %c0_23], %26 {strides = array<i32>} : memref<1x1x256xf32, #tpu.memory_space<vmem>>, vector<1x1x256xf32>,
    } else {
    }
    return
  }
  func.func @transform_0(%arg0: i32, %arg1: i32) -> (i32, i32) {
    %c0_i32 = arith.constant 0 : i32
    return %arg0, %arg1 : i32, i32
  }
  func.func @transform_1(%arg0: i32, %arg1: i32) -> (i32, i32) {
    %c0_i32 = arith.constant 0 : i32
    %c0_i32_0 = arith.constant 0 : i32
    return %arg1, %c0_i32 : i32, i32
  }
  func.func @transform_2(%arg0: i32, %arg1: i32) -> (i32, i32) {
    %c0_i32 = arith.constant 0 : i32
    %c0_i32_0 = arith.constant 0 : i32
    %c0_i32_1 = arith.constant 0 : i32
    return %c0_i32, %c0_i32_0 : i32, i32
  }
  func.func @transform_3(%arg0: i32, %arg1: i32) -> (i32, i32) {
    %c0_i32 = arith.constant 0 : i32
    %c0_i32_0 = arith.constant 0 : i32
    return %arg0, %c0_i32 : i32, i32
  }
  func.func @transform_4(%arg0: i32, %arg1: i32) -> (i32, i32, i32) {
    %c0_i32 = arith.constant 0 : i32
    %c0_i32_0 = arith.constant 0 : i32
    %c0_i32_1 = arith.constant 0 : i32
    return %arg0, %c0_i32, %c0_i32_0 : i32, i32, i32
  }
  func.func @transform_5(%arg0: i32, %arg1: i32) -> (i32, i32, i32) {
    %c0_i32 = arith.constant 0 : i32
    %c0_i32_0 = arith.constant 0 : i32
    %c0_i32_1 = arith.constant 0 : i32
    return %arg0, %c0_i32, %c0_i32_0 : i32, i32, i32
  }
}

module attributes {stable_mosaic.version = 11 : i64} {
  func.func @_stage2_kernel(%arg0: i32, %arg1: memref<32x256xf32, #tpu.memory_space<vmem>>, %arg2: memref<1x256xf32, #tpu.memory_space<vmem>>, %arg3: memref<1x256xf32, #tpu.memory_space<vmem>>, %arg4: memref<256x128xbf16, #tpu.memory_space<vmem>>, %arg5: memref<1x128xf32, #tpu.memory_space<vmem>>, %arg6: memref<128x128xbf16, #tpu.memory_space<vmem>>, %arg7: memref<1x128xf32, #tpu.memory_space<vmem>>, %arg8: memref<32x128xf32, #tpu.memory_space<vmem>>) attributes {dimension_semantics = [#tpu.dimension_semantics<parallel>], iteration_bounds = array<i64: 2>, scalar_prefetch = 0 : i64, scratch_operands = 0 : i64, tpu.core_type = #tpu.core_type<tc>, window_params = [{transform_indices = @transform_0, window_bounds = array<i64: 32, 256>}, {pipeline_mode = #tpu.pipeline_mode<synchronous>, transform_indices = @transform_1, window_bounds = array<i64: 1, 256>}, {pipeline_mode = #tpu.pipeline_mode<synchronous>, transform_indices = @transform_2, window_bounds = array<i64: 1, 256>}, {pipeline_mode = #tpu.pipeline_mode<synchronous>, transform_indices = @transform_3, window_bounds = array<i64: 256, 128>}, {pipeline_mode = #tpu.pipeline_mode<synchronous>, transform_indices = @transform_4, window_bounds = array<i64: 1, 128>}, {pipeline_mode = #tpu.pipeline_mode<synchronous>, transform_indices = @transform_5, window_bounds = array<i64: 128, 128>}, {pipeline_mode = #tpu.pipeline_mode<synchronous>, transform_indices = @transform_6, window_bounds = array<i64: 1, 128>}, {transform_indices = @transform_7, window_bounds = array<i64: 32, 128>}]} {
    %c0 = arith.constant 0 : index
    %c0_0 = arith.constant 0 : index
    %0 = vector.load %arg1[%c0, %c0_0] : memref<32x256xf32, #tpu.memory_space<vmem>>, vector<32x256xf32>
    %c0_1 = arith.constant 0 : index
    %c0_2 = arith.constant 0 : index
    %1 = vector.load %arg2[%c0_1, %c0_2] : memref<1x256xf32, #tpu.memory_space<vmem>>, vector<1x256xf32>
    %2 = vector.broadcast %1 : vector<1x256xf32> to vector<32x256xf32>
    %3 = arith.mulf %0, %2 : vector<32x256xf32>
    %c0_3 = arith.constant 0 : index
    %c0_4 = arith.constant 0 : index
    %4 = vector.load %arg3[%c0_3, %c0_4] : memref<1x256xf32, #tpu.memory_space<vmem>>, vector<1x256xf32>
    %5 = vector.broadcast %4 : vector<1x256xf32> to vector<32x256xf32>
    %6 = arith.addf %3, %5 : vector<32x256xf32>
    %7 = arith.truncf %6 : vector<32x256xf32> to vector<32x256xbf16>
    %c0_5 = arith.constant 0 : index
    %c0_6 = arith.constant 0 : index
    %8 = vector.load %arg4[%c0_5, %c0_6] : memref<256x128xbf16, #tpu.memory_space<vmem>>, vector<256x128xbf16>
    %cst = arith.constant dense<0.000000e+00> : vector<32x128xf32>
    %9 = tpu.matmul %7, %8, %cst {dimension_numbers = #tpu.dot_dimension_numbers<[1], [0], [0], [1], [0, 0, 1, 1], [], []>} : vector<32x256xbf16>, vector<256x128xbf16>, vector<32x128xf32> -> vector<32x128xf32>
    %c0_7 = arith.constant 0 : index
    %c0_8 = arith.constant 0 : index
    %10 = vector.load %arg5[%c0_7, %c0_8] : memref<1x128xf32, #tpu.memory_space<vmem>>, vector<1x128xf32>
    %11 = vector.broadcast %10 : vector<1x128xf32> to vector<32x128xf32>
    %12 = arith.addf %9, %11 : vector<32x128xf32>
    %cst_9 = arith.constant 0.000000e+00 : f32
    %13 = vector.broadcast %cst_9 : f32 to vector<32x128xf32>
    %14 = arith.maximumf %12, %13 : vector<32x128xf32>
    %15 = arith.truncf %14 : vector<32x128xf32> to vector<32x128xbf16>
    %c0_10 = arith.constant 0 : index
    %c0_11 = arith.constant 0 : index
    %16 = vector.load %arg6[%c0_10, %c0_11] : memref<128x128xbf16, #tpu.memory_space<vmem>>, vector<128x128xbf16>
    %cst_12 = arith.constant dense<0.000000e+00> : vector<32x128xf32>
    %17 = tpu.matmul %15, %16, %cst_12 {dimension_numbers = #tpu.dot_dimension_numbers<[1], [0], [0], [1], [0, 0, 1, 1], [], []>} : vector<32x128xbf16>, vector<128x128xbf16>, vector<32x128xf32> -> vector<32x128xf32>
    %c0_13 = arith.constant 0 : index
    %c0_14 = arith.constant 0 : index
    %18 = vector.load %arg7[%c0_13, %c0_14] : memref<1x128xf32, #tpu.memory_space<vmem>>, vector<1x128xf32>
    %19 = vector.broadcast %18 : vector<1x128xf32> to vector<32x128xf32>
    %20 = arith.addf %17, %19 : vector<32x128xf32>
    %c0_15 = arith.constant 0 : index
    %c0_16 = arith.constant 0 : index
    %21 = vector.load %arg8[%c0_15, %c0_16] : memref<32x128xf32, #tpu.memory_space<vmem>>, vector<32x128xf32>
    tpu.vector_store %arg8[%c0_15, %c0_16], %20 {strides = array<i32>} : memref<32x128xf32, #tpu.memory_space<vmem>>, vector<32x128xf32>,
    return
  }
  func.func @transform_0(%arg0: i32) -> (i32, i32) {
    %c0_i32 = arith.constant 0 : i32
    %c0_i32_0 = arith.constant 0 : i32
    return %arg0, %c0_i32 : i32, i32
  }
  func.func @transform_1(%arg0: i32) -> (i32, i32) {
    %c0_i32 = arith.constant 0 : i32
    %c0_i32_0 = arith.constant 0 : i32
    %c0_i32_1 = arith.constant 0 : i32
    return %c0_i32, %c0_i32_0 : i32, i32
  }
  func.func @transform_2(%arg0: i32) -> (i32, i32) {
    %c0_i32 = arith.constant 0 : i32
    %c0_i32_0 = arith.constant 0 : i32
    %c0_i32_1 = arith.constant 0 : i32
    return %c0_i32, %c0_i32_0 : i32, i32
  }
  func.func @transform_3(%arg0: i32) -> (i32, i32) {
    %c0_i32 = arith.constant 0 : i32
    %c0_i32_0 = arith.constant 0 : i32
    %c0_i32_1 = arith.constant 0 : i32
    return %c0_i32, %c0_i32_0 : i32, i32
  }
  func.func @transform_4(%arg0: i32) -> (i32, i32) {
    %c0_i32 = arith.constant 0 : i32
    %c0_i32_0 = arith.constant 0 : i32
    %c0_i32_1 = arith.constant 0 : i32
    return %c0_i32, %c0_i32_0 : i32, i32
  }
  func.func @transform_5(%arg0: i32) -> (i32, i32) {
    %c0_i32 = arith.constant 0 : i32
    %c0_i32_0 = arith.constant 0 : i32
    %c0_i32_1 = arith.constant 0 : i32
    return %c0_i32, %c0_i32_0 : i32, i32
  }
  func.func @transform_6(%arg0: i32) -> (i32, i32) {
    %c0_i32 = arith.constant 0 : i32
    %c0_i32_0 = arith.constant 0 : i32
    %c0_i32_1 = arith.constant 0 : i32
    return %c0_i32, %c0_i32_0 : i32, i32
  }
  func.func @transform_7(%arg0: i32) -> (i32, i32) {
    %c0_i32 = arith.constant 0 : i32
    %c0_i32_0 = arith.constant 0 : i32
    return %arg0, %c0_i32 : i32, i32
  }
}

</mosaic_0001>

<bundles_post_ra>
// kernel: cell_encoder.2
= control target key start
LH: loop header
LB: loop body
LE: loop exit
PB: predicated region body
PF: predicated region fallthrough
CT: control target
= control target key end

     0   :  { %s1994_s0 = inlined_call_operand.hbm [shape: bf16[64,256], index: 0, kind: input, shape index: {}]   ;;  %s1995_s1 = inlined_call_operand.hbm [shape: bf16[256,256], index: 1, kind: input, shape index: {}]   ;;  %s1996_s2 = inlined_call_operand.hbm [shape: f32[1,256], index: 2, kind: input, shape index: {}]   ;;  %s1997_s3 = inlined_call_operand.hbm [shape: f32[64,256], index: 3, kind: output, shape index: {0}]   ;;  %s1998_s4 = inlined_call_operand.hbm [shape: f32[2,1,256], index: 4, kind: output, shape index: {1}]   ;;  %s1999_s5 = inlined_call_operand.hbm [shape: f32[2,1,256], index: 5, kind: output, shape index: {2}]  }
   0x1   :  { %2023 = sst [smem:[#allocation28_spill]] %s1994_s0 }
   0x2   :  { %2024 = sst [smem:[#allocation29_spill]] %s1995_s1 }
   0x3   :  { %2025 = sst [smem:[#allocation30_spill]] %s1996_s2 }
   0x4   :  { %2026 = sst [smem:[#allocation31_spill]] %s1997_s3 }
   0x5   :  { %2027 = sst [smem:[#allocation32_spill]] %s1998_s4 }
   0x6   :  { %2028 = sst [smem:[#allocation33_spill]] %s1999_s5 }
   0x7   :  { %11 = vsyncpa [#allocation4], 0 }
   0x8   :  { %13 = vsyncpa [#allocation4 + $0x1], 0 }
   0x9   :  { %14 = vsyncpa [#allocation7], 0 }
   0xa   :  { %16 = vsyncpa [#allocation7 + $0x1], 0 }
   0xb   :  { %17 = vsyncpa [#allocation5], 0 }
   0xc   :  { %19 = vsyncpa [#allocation5 + $0x1], 0 }
   0xd   :  { %20 = vsyncpa [#allocation11], 0 }
   0xe   :  { %22 = vsyncpa [#allocation11 + $0x1], 0  ;;  %s1512_s18 = smov 0   ;;  %s1514_s19 = smov 0  }
   0xf   :  { %s1516_s20 = smov 0   ;;  %s1518_s21 = smov 0  }
  0x10   :  { %s1520_s22 = smov 0   ;;  %s1522_s23 = smov 0  }
  0x11   :  { %s1524_s24 = smov 0   ;;  %s1526_s25 = smov 0  }
  0x12   :  { %s1528_s26 = smov 0   ;;  %s1530_s27 = smov 0  }
  0x13   :  { %s1532_s28 = smov 0   ;;  %s1534_s29 = smov 0  }
  0x14   :  { %s1536_s30 = smov 0   ;;  %s1538_s6 = smov 0  }
  0x15 LB: > { %2029 = sst [smem:[#allocation18_spill]] %s1413_s18  ;;  %s1579_s7 = sadd.s32 4294967295, %s1465_s6   ;;  %s1465_s6 = sphi %s1538_s6, %s28_s6   ;;  %s1461_s30 = sphi %s1536_s30, %s2082_s30   ;;  %s1457_s29 = sphi %s1534_s29, %s2092_s29   ;;  %s1453_s28 = sphi %s1532_s28, %s2080_s28   ;;  %s1449_s27 = sphi %s1530_s27, %s2091_s27   ;;  %s1445_s26 = sphi %s1528_s26, %s2090_s26   ;;  %s1441_s25 = sphi %s1526_s25, %s2089_s25   ;;  %s1437_s24 = sphi %s1524_s24, %s2088_s24   ;;  %s1433_s23 = sphi %s1522_s23, %s2087_s23   ;;  %s1429_s22 = sphi %s1520_s22, %s2086_s22   ;;  %s1425_s21 = sphi %s1518_s21, %s2085_s21   ;;  %s1421_s20 = sphi %s1516_s20, %s2084_s20   ;;  %s1417_s19 = sphi %s1514_s19, %s2083_s19   ;;  %s1413_s18 = sphi %s1512_s18, %s2079_s18  }
  0x16   : > { %2030 = sst [smem:[#allocation19_spill]] %s1417_s19  ;;  %s2002_s8 = sadd.s32 4294967294, %s1465_s6  }
  0x17   : > { %2031 = sst [smem:[#allocation20_spill]] %s1449_s27  ;;  %p56_p0 = scmp.ne.s32.totalorder %s1445_s26, %s1441_s25 }
  0x18   : > { %2032 = sst [smem:[#allocation21_spill]] %s1453_s28  ;;  %p57_p1 = scmp.eq.s32.totalorder %s1465_s6, 0 }
  0x19   : > { %2033 = sst [smem:[#allocation22_spill]] %s1461_s30  ;;  %p62_p2 = scmp.ne.s32.totalorder %s1441_s25, %s1437_s24 }
  0x1a   : > { %p2000_p3 = scmp.eq.s32.totalorder %s1579_s7, 0  ;;  %p1589_p4 = por %p57_p1, %p56_p0 }
  0x1b   : > { %p82_p5 = scmp.ne.s32.totalorder %s1433_s23, %s1429_s22  ;;  %p88_p7 = scmp.ne.s32.totalorder %s1429_s22, %s1425_s21 }
  0x1c   : > { %p1597_p6 = por %p2000_p3, %p62_p2  ;;  %p132_p10 = scmp.ne.s32.totalorder %s1421_s20, %s1417_s19 }
  0x1d   : > { %p1602_p8 = por %p82_p5, %p57_p1  ;;  %p1609_p9 = por %p88_p7, %p2000_p3 }
  0x1e   : > { %s2035_s12 = scalar_select %p1597_p6, 1, 0 }
  0x1f   : > { %s2037_s15 = scalar_select %p1609_p9, 1, 0 }
  0x20   : > { %p133_p11 = scmp.eq.s32.totalorder %s1579_s7, 3  ;;  %p138_p12 = scmp.ne.s32.totalorder %s1417_s19, %s1413_s18 }
  0x21   : > { %2038 = sst [smem:[#allocation23_spill]] %s2037_s15  ;;  %p139_p13 = scmp.eq.s32.totalorder %s2002_s8, 3 }
  0x22   : > { %p903_p0 = scmp.ge.s32.totalorder %s1465_s6, 1  ;;  %p1621_p1 = por %p133_p11, %p132_p10 }
  0x23   : > { %p198_p2 = scmp.lt.s32.totalorder %s1465_s6, 5  ;;  %p1626_p5 = por %p139_p13, %p138_p12 }
  0x24   : > { %s2039_s16 = scalar_select %p1621_p1, 1, 0 }
  0x25   : > { %s2041_s17 = scalar_select %p1626_p5, 1, 0 }
  0x26   : > { %2040 = sst [smem:[#allocation24_spill]] %s2039_s16  ;;  %p1630_p7 = pnand %p903_p0, %p198_p2 }
  0x27   : > { %2042 = sst [smem:[#allocation25_spill]] %s2041_s17  ;;  %s1467_s24 = smov [#allocation8]  }
  0x28   : > { %s2043_s21 = scalar_select %p1630_p7, 1, 0 }
  0x29   : > { %s211_s9 = sshll.u32 %s1467_s24, 4  ;;  %p990_p3 = pneg %p1630_p7  ;;  %s212_s9 = int_to_ptr.vmem [resolvable:$true] %s211_s9 }
  0x2a   : > { %p1012_p9 = scmp.lt.s32.totalorder %s1465_s6, 4  ;;  %p2044_p10 = scmp.eq.s32.totalorder %s1579_s7, 0 }
  0x2b   : > { %s2048_s2 = sld [smem:[#allocation30_spill]] }
  0x2c   : > { %p1639_p11 = pnand %p990_p3, %p2044_p10  ;;  %p1645_p12 = pnand %p1012_p9, %p1589_p4 }
  0x2d   : > { %p1651_p13 = pnand %p1012_p9, %p1602_p8 }
  0x2e   : > { %s2046_s14 = scalar_select %p1645_p12, 1, 0 }
  0x2f   : > { %s2047_s10 = scalar_select %p1651_p13, 1, 0 }
  0x30   : > { %p1165_p0 = pneg %p1639_p11 }
  0x31   : > { %s1163_s18 = scalar_lea.hbm %s2048_s2, 32 }
  0x32   : > { %p1164_p3 = scmp.ne.s32.totalorder %s2048_s2, %s1163_s18  ;;  %p1170_p10 = scmp.lt.u32.totalorder %s1163_s18, %s2048_s2 }
  0x34   : > { %p1166_p2 = pnand %p1165_p0, %p1164_p3 }
  0x36   : > { %p1167_p4 = pneg %p1166_p2 }
  0x38   : > { %p1172_p8 = pnand %p1170_p10, %p1167_p4 }
  0x3a   : > { %1175 = shalt.err (!%p1172_p8)
}
  0x3b   : > { %s1176_s13 = scalar_lea.vmem %s212_s9, 32  ;;  %p1184_p6 = scmp.lt.s32.totalorder %s212_s9, %s212_s9 }
  0x3c   : > { %p1177_p9 = scmp.ne.s32.totalorder %s212_s9, %s1176_s13  ;;  %p1185_p7 = scmp.lt.s32.totalorder %s1176_s13, %s1176_s13 }
  0x3e   : > { %p1179_p5 = pnand %p1177_p9, %p1165_p0  ;;  %p1186_p13 = por %p1185_p7, %p1184_p6 }
  0x40   : > { %p1180_p1 = pneg %p1179_p5 }
  0x42   : > { %p1187_p12 = pnand %p1186_p13, %p1180_p1 }
  0x44   : > { %1190 = shalt.err (!%p1187_p12)
}
  0x45   : > { %993 = dma.hbm_to_vmem [thread:$0]  (!%p1639_p11), %s2048_s2, 32, %s212_s9, [#allocation7]  }
  0x46   : > { %s40_s4 = sadd.s32 1, %s1461_s30  ;;  %s37_s18 = sadd.s32 1, %s1457_s29 }
  0x47   : > { %s222_s17 = sand.u32 1, %s1445_s26   ;;  %p38_p6 = scmp.ge.s32.totalorder %s37_s18, 2 }
  0x48   : > { %s906_s24 = sshll.u32 %s222_s17, 4  ;;  %s953_s8 = sshll.u32 %s1461_s30, 3 }
  0x49   : > { %s2094_s18 = smov (%p38_p6, %s37_s18), 0  ;;  %s2096_s4 = smov (!%p38_p6, %s40_s4), %s1461_s30 }
  0x4a   : > { %2049 = sst [smem:[#allocation26_spill]] %s2094_s18  ;;  %s45_s11 = ssub.s32 %s1457_s29, %s2094_s18 }
  0x4b   : > { %p42_p1 = scmp.ge.s32.totalorder %s2096_s4, 2  ;;  %p73_p5 = scmp.eq.s32.totalorder %s45_s11, 0 }
  0x4c   : > { %s232_s9 = sadd.s32 %s1457_s29, %s953_s8  ;;  %s226_s13 = scalar_lea.vmem [#allocation3], %s906_s24 }
  0x4d   : > { %s235_s3 = sshll.u32 %s226_s13, 4  ;;  %s2098_s4 = smov (%p42_p1, %s2096_s4), 0  ;;  %s1705_s3 = int_to_ptr.vmem [resolvable:$true] %s235_s3 }
  0x4e   : > { %2050 = sst [smem:[#allocation27_spill]] %s2098_s4  ;;  %s2051_s5 = sadd.s32 1, %s1433_s23 }
  0x4f   : > { %s1686_s2 = scalar_select %p73_p5, %s1433_s23, %s2051_s5  }
  0x50   : > { %s44_s16 = ssub.s32 %s1461_s30, %s2098_s4  ;;  %s909_s28 = sshll.u32 %s232_s9, 6 }
  0x51   : > { %s46_s27 = sor.u32 %s45_s11, %s44_s16  ;;  %p120_p7 = scmp.eq.s32.totalorder %s44_s16, 0 }
  0x52   : > { %p47_p11 = scmp.eq.s32.totalorder %s46_s27, 0  ;;  %s2052_s0 = sld [smem:[#allocation28_spill]] }
  0x53   : > { %s2053_s24 = sadd.s32 1, %s1421_s20  ;;  %s2054_s13 = sadd.s32 1, %s1445_s26 }
  0x54   : > { %s1698_s8 = scalar_select %p120_p7, %s1421_s20, %s2053_s24  }
  0x55   : > { %s1703_s5 = scalar_select %p47_p11, %s1445_s26, %s2054_s13  }
  0x56   : > { %s1707_s11 = scalar_lea.sflag [#allocation4], %s222_s17  ;;  %p2055_p13 = scmp.ne.s32.totalorder %s2046_s14, 0 }
  0x58   : > { %s1693_s15 = scalar_lea.hbm %s2052_s0, %s909_s28  ;;  %p1193_p3 = pneg %p2055_p13 }
  0x59   : > { %s1191_s27 = scalar_lea.hbm %s1693_s15, 256  ;;  %s1196_s16 = scalar_lea.hbm %s2052_s0, 1024 }
  0x5a   : > { %p1192_p12 = scmp.ne.s32.totalorder %s1693_s15, %s1191_s27  ;;  %p1197_p4 = scmp.lt.u32.totalorder %s1693_s15, %s2052_s0 }
  0x5b   : > { %p1198_p10 = scmp.lt.u32.totalorder %s1196_s16, %s1191_s27  ;;  %p1200_p9 = scmp.lt.u32.totalorder %s1191_s27, %s1693_s15 }
  0x5c   : > { %p1194_p0 = pnand %p1193_p3, %p1192_p12 }
  0x5d   : > { %p1199_p8 = por %p1198_p10, %p1197_p4 }
  0x5e   : > { %p1195_p2 = pneg %p1194_p0 }
  0x5f   : > { %p1201_p6 = por %p1200_p9, %p1199_p8 }
  0x61   : > { %p1202_p1 = pnand %p1201_p6, %p1195_p2 }
  0x63   : > { %1205 = shalt.err (!%p1202_p1)
}
  0x64   : > { %s1206_s17 = scalar_lea.vmem %s1705_s3, 256  ;;  %s1468_s24 = smov [#allocation3]  }
  0x65   : > { %p1207_p5 = scmp.ne.s32.totalorder %s1705_s3, %s1206_s17  ;;  %s1211_s13 = sshll.u32 %s1468_s24, 4  ;;  %s1212_s13 = int_to_ptr.vmem [resolvable:$false] %s1211_s13 }
  0x66   : > { %s1213_s19 = scalar_lea.vmem %s1212_s13, 512  ;;  %p1214_p12 = scmp.lt.s32.totalorder %s1705_s3, %s1212_s13 }
  0x67   : > { %p1209_p7 = pnand %p1207_p5, %p1193_p3  ;;  %p1215_p0 = scmp.lt.s32.totalorder %s1213_s19, %s1206_s17 }
  0x69   : > { %p1210_p11 = pneg %p1209_p7  ;;  %p1216_p4 = por %p1215_p0, %p1214_p12 }
  0x6b   : > { %p1217_p10 = pnand %p1216_p4, %p1210_p11 }
  0x6d   : > { %1220 = shalt.err (!%p1217_p10)
}
  0x6e   : > { %s1469_s27 = smov 128   ;;  %s1470_s28 = smov 64  }
  0x6f   : > { %s1471_s16 = smov 4   ;;  %s245_s18 = sand.u32 1, %s1465_s6  }
  0x70   : > { %997 = dma.hbm_to_vmem [thread:$0]  (!%p2055_p13), %s1693_s15, 256, %s1705_s3, %s1707_s11, %s1469_s27, %s1470_s28, %s1471_s16  }
  0x71   : > { %s247_s9 = sand.u32 1, %s1433_s23   ;;  %s955_s24 = sshll.u32 %s1457_s29, 11 }
  0x72   : > { %s910_s17 = sshll.u32 %s247_s9, 7  ;;  %s2056_s1 = sld [smem:[#allocation29_spill]] }
  0x73   : > { %s249_s4 = scalar_lea.vmem [#allocation6], %s910_s17  ;;  %s1746_s14 = scalar_lea.sflag [#allocation7], %s245_s18 }
  0x74   : > { %s257_s30 = sshll.u32 %s249_s4, 4  ;;  %p2057_p3 = scmp.ne.s32.totalorder %s2047_s10, 0  ;;  %s1744_s30 = int_to_ptr.vmem [resolvable:$true] %s257_s30 }
  0x76   : > { %p1223_p2 = pneg %p2057_p3 }
  0x78   : > { %s1742_s0 = scalar_lea.hbm %s2056_s1, %s955_s24  ;;  %s1226_s28 = scalar_lea.hbm %s2056_s1, 4096 }
  0x79   : > { %s1221_s15 = scalar_lea.hbm %s1742_s0, 2048  ;;  %p1227_p6 = scmp.lt.u32.totalorder %s1742_s0, %s2056_s1 }
  0x7a   : > { %p1222_p13 = scmp.ne.s32.totalorder %s1742_s0, %s1221_s15  ;;  %p1228_p1 = scmp.lt.u32.totalorder %s1226_s28, %s1221_s15 }
  0x7b   : > { %p1230_p7 = scmp.lt.u32.totalorder %s1221_s15, %s1742_s0 }
  0x7c   : > { %p1224_p8 = pnand %p1223_p2, %p1222_p13  ;;  %p1229_p5 = por %p1228_p1, %p1227_p6 }
  0x7e   : > { %p1225_p9 = pneg %p1224_p8  ;;  %p1231_p11 = por %p1230_p7, %p1229_p5 }
  0x80   : > { %p1232_p12 = pnand %p1231_p11, %p1225_p9 }
  0x82   : > { %1235 = shalt.err (!%p1232_p12)
}
  0x83   : > { %s1236_s4 = scalar_lea.vmem %s1744_s30, 2048  ;;  %s1472_s18 = smov [#allocation6]  }
  0x84   : > { %p1237_p0 = scmp.ne.s32.totalorder %s1744_s30, %s1236_s4  ;;  %s1241_s17 = sshll.u32 %s1472_s18, 4  ;;  %s1242_s17 = int_to_ptr.vmem [resolvable:$false] %s1241_s17 }
  0x85   : > { %s1243_s24 = scalar_lea.vmem %s1242_s17, 4096  ;;  %p1244_p13 = scmp.lt.s32.totalorder %s1744_s30, %s1242_s17 }
  0x86   : > { %p1239_p4 = pnand %p1237_p0, %p1223_p2  ;;  %p1245_p8 = scmp.lt.s32.totalorder %s1243_s24, %s1236_s4 }
  0x88   : > { %p1240_p10 = pneg %p1239_p4  ;;  %p1246_p6 = por %p1245_p8, %p1244_p13 }
  0x8a   : > { %p1247_p1 = pnand %p1246_p6, %p1240_p10 }
  0x8c   : > { %1250 = shalt.err (!%p1247_p1)
}
  0x8d   : > { %s1473_s13 = smov 8   ;;  %p2058_p2 = scmp.ne.s32.totalorder %s2043_s21, 0 }
  0x8e   : > { %1000 = dma.hbm_to_vmem [thread:$0]  (!%p2057_p3), %s1742_s0, 2048, %s1744_s30, %s1746_s14, %s1469_s27, %s1469_s27, %s1473_s13  }
  0x8f   : > { %269 = sbr.rel (%p2058_p2) target bundleno = 546 (0x222), region = 32  ;;  %s271_s19 = sand.u32 (!%p2058_p2), 1, %s1441_s25  }
  0x90   : > { %s1779_s15 = sshll.u32 (!%p2058_p2), %s271_s19, 4  ;;  %s272_s3 = scalar_lea.sflag (!%p2058_p2), [#allocation4], %s271_s19 }
  0x91   : > { %s275_s11 = scalar_lea.vmem (!%p2058_p2), [#allocation3], %s1779_s15  ;;  %p2059_p9 = scmp.ne.s32.totalorder (!%p2058_p2), %s2035_s12, 0 }
  0x96   : > { %1392 = dma.done.wait (%p2059_p9), %s272_s3, 256  }
  0x97   : > { %1394 = vsyncadd (%p2059_p9), %s272_s3, 4294967040  ;;  %s2060_s0 = sld [smem:[#allocation23_spill]]  ;;  %s280_s30 = sand.u32 1, %s1579_s7  }
  0x98   : > { %s282_s10 = sand.u32 1, %s1429_s22   ;;  %s281_s27 = scalar_lea.sflag [#allocation7], %s280_s30 }
  0x99   : > { %s916_s21 = sshll.u32 %s282_s10, 7 }
  0x9a   : > { %s1790_s14 = scalar_lea.vmem [#allocation6], %s916_s21 }
  0x9d   : > { %p2061_p3 = scmp.ne.s32.totalorder %s2060_s0, 0 }
  0x9f   : > { %1396 = dma.done.wait (%p2061_p3), %s281_s27, 2048  }
  0xa0   : > { %1398 = vsyncadd (%p2061_p3), %s281_s27, 4294965248  ;;  %p2062_p5 = scmp.eq.s32.totalorder %s1579_s7, 0 }
  0xa2   : > { %1400 = dma.done.wait (%p2062_p5), [#allocation7], 32   ;;  %p2063_p7 = pmov %p2062_p5 }
  0xa3   : > { %s2064_s12 = sld [smem:[#allocation19_spill]]  ;;  %s2065_s24 = sld [smem:[#allocation20_spill]] }
  0xa4   : > { %1402 = vsyncadd (%p2063_p7), [#allocation7], 4294967264 }
  0xa9   : > { %s1801_s28 = sand.u32 1, %s2064_s12   ;;  %p921_p11 = scmp.ne.s32.totalorder %s2065_s24, 0 }
  0xaa   : > { %s918_s16 = sshll.u32 %s1801_s28, 6  ;;  %s919_s9 = sshll.u32 %s1801_s28, 1  ;;  %v1474_v0 = vmov (!%p921_p11), 0.0  }
  0xab   : > { %s1805_s4 = scalar_lea.vmem [#allocation9], %s918_s16  ;;  %s1807_s18 = scalar_lea.vmem [#allocation10], %s919_s9  ;;  %338 = vst [vmem:[#allocation2] sm:$0xff] (!%p921_p11), %v1474_v0  ;;  %339 = vst [vmem:[#allocation2 + $0x8] sm:$0xff] (!%p921_p11), %v1474_v0 }
  0xac   : > { %s1809_s17 = scalar_lea.vmem [#allocation12], %s919_s9  ;;  %337 = sbr.rel (%p921_p11) target bundleno = 179 (0xb3), region = 48  ;;  %340 = vst [vmem:[#allocation2 + $0x10] sm:$0xff] (!%p921_p11), %v1474_v0  ;;  %341 = vst [vmem:[#allocation2 + $0x18] sm:$0xff] (!%p921_p11), %v1474_v0 }
  0xad   : > { %342 = vst [vmem:[#allocation2 + $0x20] sm:$0xff] (!%p921_p11), %v1474_v0  ;;  %343 = vst [vmem:[#allocation2 + $0x28] sm:$0xff] (!%p921_p11), %v1474_v0 }
  0xae   : > { %344 = vst [vmem:[#allocation2 + $0x30] sm:$0xff] (!%p921_p11), %v1474_v0  ;;  %345 = vst [vmem:[#allocation2 + $0x38] sm:$0xff] (!%p921_p11), %v1474_v0 }
  0xb3 PF: > { %v1137_v1 = vld [vmem:[%s1790_s14 + $0x4] ss:$8 sps:$4 sm:$0xff]   ;;  %v1139_v2 = vld [vmem:[%s1790_s14] ss:$8 sps:$4 sm:$0xff]   ;;  %v1475_v3 = vmov 0   ;;  %v348_v26 = vld [vmem:[#allocation2 + $0x10] sm:$0xff] }
  0xb4   : > { %498 = vmatprep.mubr.bf16.mxu0 %v1475_v3  ;;  %508 = vmatprep.mubr.bf16.mxu1 %v1475_v3  ;;  %v1140_v4 = vld [vmem:[%s1790_s14 + $0x14] ss:$8 sps:$4 sm:$0xff]   ;;  %v1142_v5 = vld [vmem:[%s1790_s14 + $0x10] ss:$8 sps:$4 sm:$0xff]   ;;  %v1143_v6 = vld [vmem:[%s1790_s14 + $0x24] ss:$8 sps:$4 sm:$0xff]  }
  0xb5   : > { %466 = vmatprep.subr.bf16.mxu0 %v1137_v1  ;;  %960 = vmatprep.subr.bf16.mxu1 %v1137_v1  ;;  %v1145_v7 = vld [vmem:[%s1790_s14 + $0x20] ss:$8 sps:$4 sm:$0xff]   ;;  %v1146_v8 = vld [vmem:[%s1790_s14 + $0x34] ss:$8 sps:$4 sm:$0xff]   ;;  %v1148_v9 = vld [vmem:[%s1790_s14 + $0x30] ss:$8 sps:$4 sm:$0xff]  }
  0xb6   : > { %467 = vmatpush1.bf16.msra.mxu0 %v1139_v2  ;;  %968 = vmatpush1.bf16.msra.mxu1 %v1139_v2  ;;  %v1149_v10 = vld [vmem:[%s1790_s14 + $0x44] ss:$8 sps:$4 sm:$0xff]   ;;  %v1151_v11 = vld [vmem:[%s1790_s14 + $0x40] ss:$8 sps:$4 sm:$0xff]   ;;  %v1152_v12 = vld [vmem:[%s1790_s14 + $0x54] ss:$8 sps:$4 sm:$0xff]  }
  0xb7   : > { %468 = vmatprep.subr.bf16.mxu0 %v1140_v4  ;;  %961 = vmatprep.subr.bf16.mxu1 %v1140_v4  ;;  %v1154_v13 = vld [vmem:[%s1790_s14 + $0x50] ss:$8 sps:$4 sm:$0xff]   ;;  %v1155_v14 = vld [vmem:[%s1790_s14 + $0x64] ss:$8 sps:$4 sm:$0xff]   ;;  %v1157_v15 = vld [vmem:[%s1790_s14 + $0x60] ss:$8 sps:$4 sm:$0xff]  }
  0xb8   : > { %v1158_v16 = vld [vmem:[%s1790_s14 + $0x74] ss:$8 sps:$4 sm:$0xff]   ;;  %v1160_v17 = vld [vmem:[%s1790_s14 + $0x70] ss:$8 sps:$4 sm:$0xff]   ;;  %v346_v20 = vld [vmem:[#allocation2] sm:$0xff]  ;;  %s2066_s13 = sld [smem:[#allocation20_spill]] }
  0xb9   : > { %v1161_v18 = vld [vmem:[%s275_s11] sm:$0xff]   ;;  %v1162_v19 = vld [vmem:[%s275_s11 + $0x8] sm:$0xff]  }
  0xba   : > { %469 = vmatpush1.bf16.msra.mxu0 %v1142_v5  ;;  %969 = vmatpush1.bf16.msra.mxu1 %v1142_v5  ;;  %v350_v21 = vld [vmem:[#allocation2 + $0x20] sm:$0xff]  ;;  %v347_v22 = vld [vmem:[#allocation2 + $0x8] sm:$0xff]  ;;  %v352_v27 = vld [vmem:[#allocation2 + $0x30] sm:$0xff] }
  0xbb   : > { %470 = vmatprep.subr.bf16.mxu0 %v1143_v6  ;;  %962 = vmatprep.subr.bf16.mxu1 %v1143_v6  ;;  %v351_v23 = vld [vmem:[#allocation2 + $0x28] sm:$0xff]  ;;  %v349_v32 = vld [vmem:[#allocation2 + $0x18] sm:$0xff] }
  0xbc   : > { %v353_v33 = vld [vmem:[#allocation2 + $0x38] sm:$0xff] }
  0xbe   : > { %471 = vmatpush1.bf16.msra.mxu0 %v1145_v7  ;;  %970 = vmatpush1.bf16.msra.mxu1 %v1145_v7  ;;  %p940_p12 = scmp.ne.s32.totalorder %s2066_s13, 1 }
  0xbf   : > { %472 = vmatprep.subr.bf16.mxu0 %v1146_v8  ;;  %963 = vmatprep.subr.bf16.mxu1 %v1146_v8  ;;  %v549_v44 = vlaneseq (!%p940_p12)  ;;  %v547_v46 = vld [vmem:[#allocation8] sm:$0x3] (!%p940_p12) }
  0xc1   : > { %v1834_v45 = vshrl.u32 (!%p940_p12), %v549_v44, 7  ;;  %vm647_vm0 = vcmp.lt.s32.totalorder (!%p940_p12), %v549_v44, 256 }
  0xc2   : > { %473 = vmatpush1.bf16.msra.mxu0 %v1148_v9  ;;  %971 = vmatpush1.bf16.msra.mxu1 %v1148_v9 }
  0xc3   : > { %474 = vmatprep.subr.bf16.mxu0 %v1149_v10  ;;  %964 = vmatprep.subr.bf16.mxu1 %v1149_v10  ;;  %v551_v48 = vsub.s32 (!%p940_p12), 0, %v1834_v45  ;;  %v555_v50 = vsub.s32 (!%p940_p12), 1, %v1834_v45 }
  0xc5   : > { %v552_v54 = vrot.slane (!%p940_p12), %v547_v46, %v551_v48  ;;  %v556_v55 = vrot.slane (!%p940_p12), %v547_v46, %v555_v50 }
  0xc6   : > { %475 = vmatpush1.bf16.msra.mxu0 %v1151_v11  ;;  %972 = vmatpush1.bf16.msra.mxu1 %v1151_v11 }
  0xc7   : > { %476 = vmatprep.subr.bf16.mxu0 %v1152_v12  ;;  %965 = vmatprep.subr.bf16.mxu1 %v1152_v12 }
  0xca   : > { %477 = vmatpush1.bf16.msra.mxu0 %v1154_v13  ;;  %973 = vmatpush1.bf16.msra.mxu1 %v1154_v13 }
  0xcb   : > { %478 = vmatprep.subr.bf16.mxu0 %v1155_v14  ;;  %966 = vmatprep.subr.bf16.mxu1 %v1155_v14 }
  0xce   : > { %479 = vmatpush1.bf16.msra.mxu0 %v1157_v15  ;;  %974 = vmatpush1.bf16.msra.mxu1 %v1157_v15 }
  0xcf   : > { %480 = vmatprep.subr.bf16.mxu0 %v1158_v16  ;;  %967 = vmatprep.subr.bf16.mxu1 %v1158_v16 }
  0xd2   : > { %481 = vmatpush1.bf16.msra.mxu0 %v1160_v17  ;;  %975 = vmatpush1.bf16.msra.mxu1 %v1160_v17 }
  0xd5   : > { %499 = vmatmul.mubr.bf16.vlgmr.msra.gmra.mrb[0].mxu0 %v1161_v18  ;;  %509 = vmatmul.mubr.bf16.vlgmr.msra.gmra.mrb[0].mxu1 %v1162_v19 }
 0x1a8   : > { %v500_v24 = vpop.f32.mrb[0].mxu0  ;;  %v510_v25 = vpop.f32.mrb[0].mxu1  ;;  %538 = sbr.rel (%p940_p12) target bundleno = 469 (0x1d5), region = 52 }
 0x1a9   : > { %v519_v28 = vadd.f32 %v500_v24, %v346_v20  ;;  %v523_v29 = vadd.f32 %v510_v25, %v350_v21  ;;  %v502_v30 = vpop.f32.mrb[1].mxu0  ;;  %v512_v31 = vpop.f32.mrb[1].mxu1 }
 0x1aa   : > { %v520_v34 = vadd.f32 %v502_v30, %v347_v22  ;;  %v524_v35 = vadd.f32 %v512_v31, %v351_v23  ;;  %v504_v36 = vpop.f32.mrb[2].mxu0  ;;  %v514_v37 = vpop.f32.mrb[2].mxu1 }
 0x1ab   : > { %527 = vst [vmem:[#allocation2] sm:$0xff] %v519_v28  ;;  %531 = vst [vmem:[#allocation2 + $0x20] sm:$0xff] %v523_v29  ;;  %v521_v38 = vadd.f32 %v504_v36, %v348_v26  ;;  %v525_v39 = vadd.f32 %v514_v37, %v352_v27  ;;  %v506_v40 = vpop.f32.mrb[3].mxu0  ;;  %v516_v41 = vpop.f32.mrb[3].mxu1  ;;  %v1476_v37 = vmov (!%p940_p12), 1966171168  }
 0x1ac   : > { %528 = vst [vmem:[#allocation2 + $0x8] sm:$0xff] %v520_v34  ;;  %532 = vst [vmem:[#allocation2 + $0x28] sm:$0xff] %v524_v35  ;;  %v522_v42 = vadd.f32 %v506_v40, %v349_v32  ;;  %v526_v43 = vadd.f32 %v516_v41, %v353_v33 }
 0x1ad   : > { %529 = vst [vmem:[#allocation2 + $0x10] sm:$0xff] %v521_v38  ;;  %533 = vst [vmem:[#allocation2 + $0x30] sm:$0xff] %v525_v39  ;;  %v631_v38 = vunpack.c.l.s4 (!%p940_p12), %v1476_v37 }
 0x1ae   : > { %530 = vst [vmem:[#allocation2 + $0x18] sm:$0xff] %v522_v42  ;;  %534 = vst [vmem:[#allocation2 + $0x38] sm:$0xff] %v526_v43 }
 0x1af   : > { %v632_v48 = vunpack.c.0.s8 %v631_v38 }
 0x1b2   : > { %v539_v47 = vld [vmem:[#allocation2] sm:$0xff] }
 0x1b3   : > { %v540_v49 = vld [vmem:[#allocation2 + $0x8] sm:$0xff]  ;;  %v543_v53 = vld [vmem:[#allocation2 + $0x20] sm:$0xff]  ;;  %v559_v59 = vadd.f32 %v552_v54, %v539_v47 }
 0x1b4   : > { %v541_v51 = vld [vmem:[#allocation2 + $0x10] sm:$0xff]  ;;  %v544_v56 = vld [vmem:[#allocation2 + $0x28] sm:$0xff]  ;;  %v560_v60 = vadd.f32 %v556_v55, %v540_v49  ;;  %v563_v63 = vadd.f32 %v552_v54, %v543_v53 }
 0x1b5   : > { %v542_v52 = vld [vmem:[#allocation2 + $0x18] sm:$0xff]  ;;  %v545_v57 = vld [vmem:[#allocation2 + $0x30] sm:$0xff]  ;;  %v561_v61 = vadd.f32 %v552_v54, %v541_v51  ;;  %v564_v0 = vadd.f32 %v556_v55, %v544_v56  ;;  %v567_v3 = vmax.f32 %v559_v59, 0.0 }
 0x1b6   : > { %v546_v58 = vld [vmem:[#allocation2 + $0x38] sm:$0xff]  ;;  %v562_v62 = vadd.f32 %v556_v55, %v542_v52  ;;  %v565_v1 = vadd.f32 %v552_v54, %v545_v57  ;;  %v568_v4 = vmax.f32 %v560_v60, 0.0  ;;  %v571_v7 = vmax.f32 %v563_v63, 0.0 }
 0x1b7   : > { %v566_v2 = vadd.f32 %v556_v55, %v546_v58  ;;  %v569_v5 = vmax.f32 %v561_v61, 0.0  ;;  %v572_v8 = vmax.f32 %v564_v0, 0.0  ;;  %575 = vst [vmem:[%s1805_s4] sm:$0xff] %v567_v3  ;;  %v601_v11 = vmul.f32 %v567_v3, %v567_v3 }
 0x1b8   : > { %v570_v6 = vmax.f32 %v562_v62, 0.0  ;;  %v573_v9 = vmax.f32 %v565_v1, 0.0  ;;  %576 = vst [vmem:[%s1805_s4 + $0x8] sm:$0xff] %v568_v4  ;;  %v602_v12 = vmul.f32 %v568_v4, %v568_v4  ;;  %579 = vst [vmem:[%s1805_s4 + $0x20] sm:$0xff] %v571_v7  ;;  %v605_v17 = vmul.f32 %v571_v7, %v571_v7 }
 0x1b9   : > { %v574_v10 = vmax.f32 %v566_v2, 0.0  ;;  %577 = vst [vmem:[%s1805_s4 + $0x10] sm:$0xff] %v569_v5  ;;  %v583_v13 = vadd.f32 %v569_v5, %v567_v3  ;;  %v603_v14 = vmul.f32 %v569_v5, %v569_v5  ;;  %580 = vst [vmem:[%s1805_s4 + $0x28] sm:$0xff] %v572_v8  ;;  %v606_v18 = vmul.f32 %v572_v8, %v572_v8 }
 0x1ba   : > { %578 = vst [vmem:[%s1805_s4 + $0x18] sm:$0xff] %v570_v6  ;;  %v592_v15 = vadd.f32 %v570_v6, %v568_v4  ;;  %v604_v16 = vmul.f32 %v570_v6, %v570_v6  ;;  %581 = vst [vmem:[%s1805_s4 + $0x30] sm:$0xff] %v573_v9  ;;  %v607_v21 = vmul.f32 %v573_v9, %v573_v9 }
 0x1bb   : > { %582 = vst [vmem:[%s1805_s4 + $0x38] sm:$0xff] %v574_v10  ;;  %v609_v19 = vadd.f32 %v603_v14, %v601_v11  ;;  %v584_v20 = vadd.f32 %v583_v13, %v571_v7  ;;  %v608_v24 = vmul.f32 %v574_v10, %v574_v10  ;;  %v635_v57 = vsub.s32 %v632_v48, %v1834_v45 }
 0x1bc   : > { %v618_v22 = vadd.f32 %v604_v16, %v602_v12  ;;  %v593_v23 = vadd.f32 %v592_v15, %v572_v8 }
 0x1bd   : > { %v610_v25 = vadd.f32 %v609_v19, %v605_v17  ;;  %v585_v26 = vadd.f32 %v584_v20, %v573_v9 }
 0x1be   : > { %v619_v27 = vadd.f32 %v618_v22, %v606_v18  ;;  %v594_v28 = vadd.f32 %v593_v23, %v574_v10 }
 0x1bf   : > { %v586_v29 = vrot.slane %v585_v26, 4  ;;  %v611_v30 = vadd.f32 %v610_v25, %v607_v21 }
 0x1c0   : > { %v595_v31 = vrot.slane %v594_v28, 4  ;;  %v620_v32 = vadd.f32 %v619_v27, %v608_v24 }
 0x1c1   : > { %v587_v33 = vadd.f32 %v586_v29, %v585_v26  ;;  %v612_v34 = vrot.slane %v611_v30, 4 }
 0x1c2   : > { %v596_v35 = vadd.f32 %v595_v31, %v594_v28  ;;  %v621_v36 = vrot.slane %v620_v32, 4 }
 0x1c3   : > { %v588_v39 = vrot.slane %v587_v33, 2  ;;  %v613_v40 = vadd.f32 %v612_v34, %v611_v30 }
 0x1c4   : > { %v597_v41 = vrot.slane %v596_v35, 2  ;;  %v622_v42 = vadd.f32 %v621_v36, %v620_v32 }
 0x1c5   : > { %v589_v43 = vadd.f32 %v588_v39, %v587_v33  ;;  %v614_v46 = vrot.slane %v613_v40, 2 }
 0x1c6   : > { %v598_v47 = vadd.f32 %v597_v41, %v596_v35  ;;  %v623_v49 = vrot.slane %v622_v42, 2 }
 0x1c7   : > { %v590_v50 = vrot.slane %v589_v43, 1  ;;  %v615_v51 = vadd.f32 %v614_v46, %v613_v40 }
 0x1c8   : > { %v599_v52 = vrot.slane %v598_v47, 1  ;;  %v624_v53 = vadd.f32 %v623_v49, %v622_v42 }
 0x1c9   : > { %v591_v54 = vadd.f32 %v590_v50, %v589_v43  ;;  %v616_v55 = vrot.slane %v615_v51, 1 }
 0x1ca   : > { %v600_v56 = vadd.f32 %v599_v52, %v598_v47  ;;  %v625_v58 = vrot.slane %v624_v53, 1 }
 0x1cb   : > { %v617_v59 = vadd.f32 %v616_v55, %v615_v51 }
 0x1cc   : > { %v629_v60 = vcombine.low %v591_v54, %v600_v56  ;;  %v626_v61 = vadd.f32 %v625_v58, %v624_v53 }
 0x1ce   : > { %v636_v62 = vrot.slane %v629_v60, %v635_v57  ;;  %v652_v63 = vcombine.low %v617_v59, %v626_v61 }
 0x1d0   : > { %v643_v0 = vrot.slane %v636_v62, %v635_v57  ;;  %v659_v1 = vrot.slane %v652_v63, %v635_v57 }
 0x1d2   : > { %649 = vst.msk [vmem:[%s1807_s18] sm:$0x3] %vm647_vm0, %v643_v0  ;;  %v666_v2 = vrot.slane %v659_v1, %v635_v57 }
 0x1d4   : > { %668 = vst.msk [vmem:[%s1809_s17] sm:$0x3] %vm647_vm0, %v666_v2 }
 0x1d5 PF: > { %s2067_s19 = sld [smem:[#allocation21_spill]]  ;;  %s2068_s15 = sld [smem:[#allocation24_spill]] }
 0x1d6   : > { %s2069_s10 = sld [smem:[#allocation32_spill]]  ;;  %s711_s27 = sshll.u32 %s1807_s18, 4  ;;  %s712_s27 = int_to_ptr.vmem [resolvable:$true] %s711_s27 }
 0x1d7   : > { %s1861_s14 = scalar_lea.sflag [#allocation11], %s280_s30  ;;  %s1251_s12 = scalar_lea.vmem %s712_s27, 32 }
 0x1d8   : > { %p1252_p0 = scmp.ne.s32.totalorder %s712_s27, %s1251_s12  ;;  %s1477_s16 = smov [#allocation10]  }
 0x1d9   : > { %s1255_s9 = sshll.u32 %s1477_s16, 4  ;;  %s1256_s9 = int_to_ptr.vmem [resolvable:$false] %s1255_s9 }
 0x1da   : > { %s1257_s24 = scalar_lea.vmem %s1256_s9, 64  ;;  %p1258_p8 = scmp.lt.s32.totalorder %s712_s27, %s1256_s9 }
 0x1db   : > { %s958_s3 = sshll.u32 %s2067_s19, 5  ;;  %p2070_p4 = scmp.ne.s32.totalorder %s2068_s15, 0 }
 0x1dc   : > { %s1856_s21 = scalar_lea.hbm %s2069_s10, %s958_s3  ;;  %p1259_p6 = scmp.lt.s32.totalorder %s1257_s24, %s1251_s12 }
 0x1dd   : > { %p1253_p10 = pnand %p1252_p0, %p2070_p4 }
 0x1de   : > { %p1260_p1 = por %p1259_p6, %p1258_p8 }
 0x1df   : > { %p1254_p13 = pneg %p1253_p10 }
 0x1e1   : > { %p1261_p2 = pnand %p1260_p1, %p1254_p13 }
 0x1e3   : > { %1264 = shalt.err (!%p1261_p2)
}
 0x1e4   : > { %s1265_s7 = scalar_lea.hbm %s1856_s21, 32  ;;  %s1269_s13 = scalar_lea.hbm %s2069_s10, 64 }
 0x1e5   : > { %p1266_p9 = scmp.ne.s32.totalorder %s1856_s21, %s1265_s7  ;;  %p1270_p7 = scmp.lt.u32.totalorder %s1856_s21, %s2069_s10 }
 0x1e6   : > { %p1271_p11 = scmp.lt.u32.totalorder %s1269_s13, %s1265_s7  ;;  %p1273_p0 = scmp.lt.u32.totalorder %s1265_s7, %s1856_s21 }
 0x1e7   : > { %p1267_p3 = pnand %p1266_p9, %p2070_p4 }
 0x1e8   : > { %p1272_p12 = por %p1271_p11, %p1270_p7 }
 0x1e9   : > { %p1268_p5 = pneg %p1267_p3 }
 0x1ea   : > { %p1274_p10 = por %p1273_p0, %p1272_p12 }
 0x1ec   : > { %p1275_p13 = pnand %p1274_p10, %p1268_p5 }
 0x1ee   : > { %1278 = shalt.err (!%p1275_p13)
}
 0x1ef   : > { %985 = dma.vmem_to_hbm [thread:$0]  (%p2070_p4), %s712_s27, 32, %s1856_s21, %s1861_s14  }
 0x1f0   : > { %s957_s12 = sshll.u32 %s2067_s19, 10  ;;  %s694_s16 = sshll.u32 %s1805_s4, 4  ;;  %s1888_s16 = int_to_ptr.vmem [resolvable:$true] %s694_s16 }
 0x1f1   : > { %s2071_s30 = sld [smem:[#allocation31_spill]]  ;;  %s670_s7 = scalar_lea.sflag [#allocation5], %s1801_s28 }
 0x1f2   : > { %s1279_s13 = scalar_lea.vmem %s1888_s16, 1024  ;;  %s1478_s0 = smov [#allocation9]  }
 0x1f3   : > { %p1280_p8 = scmp.ne.s32.totalorder %s1888_s16, %s1279_s13  ;;  %s1283_s21 = sshll.u32 %s1478_s0, 4  ;;  %s1284_s21 = int_to_ptr.vmem [resolvable:$false] %s1283_s21 }
 0x1f4   : > { %s1285_s4 = scalar_lea.vmem %s1284_s21, 2048  ;;  %p1286_p2 = scmp.lt.s32.totalorder %s1888_s16, %s1284_s21 }
 0x1f5   : > { %p1281_p6 = pnand %p1280_p8, %p2070_p4  ;;  %p1287_p9 = scmp.lt.s32.totalorder %s1285_s4, %s1279_s13 }
 0x1f7   : > { %s2072_s11 = smov %s2071_s30  ;;  %s1886_s18 = scalar_lea.hbm %s2071_s30, %s957_s12 }
 0x1f8   : > { %p1282_p1 = pneg %p1281_p6  ;;  %p1288_p3 = por %p1287_p9, %p1286_p2 }
 0x1fa   : > { %p1289_p5 = pnand %p1288_p3, %p1282_p1 }
 0x1fc   : > { %1292 = shalt.err (!%p1289_p5)
}
 0x1fd   : > { %s1293_s27 = scalar_lea.hbm %s1886_s18, 1024  ;;  %s1297_s24 = scalar_lea.hbm %s2072_s11, 2048 }
 0x1fe   : > { %p1294_p7 = scmp.ne.s32.totalorder %s1886_s18, %s1293_s27  ;;  %p1298_p0 = scmp.lt.u32.totalorder %s1886_s18, %s2072_s11 }
 0x1ff   : > { %p1299_p10 = scmp.lt.u32.totalorder %s1297_s24, %s1293_s27  ;;  %p1301_p8 = scmp.lt.u32.totalorder %s1293_s27, %s1886_s18 }
 0x200   : > { %p1295_p11 = pnand %p1294_p7, %p2070_p4 }
 0x201   : > { %p1300_p13 = por %p1299_p10, %p1298_p0 }
 0x202   : > { %p1296_p12 = pneg %p1295_p11 }
 0x203   : > { %p1302_p6 = por %p1301_p8, %p1300_p13 }
 0x205   : > { %p1303_p1 = pnand %p1302_p6, %p1296_p12 }
 0x207   : > { %1306 = shalt.err (!%p1303_p1)
}
 0x208   : > { %s1479_s13 = smov 256   ;;  %s1480_s21 = smov 16  }
 0x209   : > { %984 = dma.vmem_to_hbm [thread:$0]  (%p2070_p4), %s1888_s16, 1024, %s1886_s18, %s670_s7, %s1479_s13, %s1479_s13, %s1480_s21  }
 0x20a   : > { %s2073_s9 = sld [smem:[#allocation33_spill]]  ;;  %s725_s24 = sshll.u32 %s1809_s17, 4  ;;  %s726_s24 = int_to_ptr.vmem [resolvable:$true] %s725_s24 }
 0x20b   : > { %s1307_s30 = scalar_lea.vmem %s726_s24, 32  ;;  %s1481_s0 = smov [#allocation12]  }
 0x20c   : > { %p1308_p2 = scmp.ne.s32.totalorder %s726_s24, %s1307_s30  ;;  %s1311_s1 = sshll.u32 %s1481_s0, 4  ;;  %s1312_s1 = int_to_ptr.vmem [resolvable:$false] %s1311_s1 }
 0x20d   : > { %s1313_s10 = scalar_lea.vmem %s1312_s1, 64  ;;  %p1314_p5 = scmp.lt.s32.totalorder %s726_s24, %s1312_s1 }
 0x20e   : > { %p1309_p9 = pnand %p1308_p2, %p2070_p4  ;;  %p1315_p7 = scmp.lt.s32.totalorder %s1313_s10, %s1307_s30 }
 0x210   : > { %s1919_s27 = scalar_lea.hbm %s2073_s9, %s958_s3  ;;  %p1310_p3 = pneg %p1309_p9 }
 0x211   : > { %p1316_p11 = por %p1315_p7, %p1314_p5 }
 0x213   : > { %p1317_p12 = pnand %p1316_p11, %p1310_p3 }
 0x215   : > { %1320 = shalt.err (!%p1317_p12)
}
 0x216   : > { %s1321_s28 = scalar_lea.hbm %s1919_s27, 32  ;;  %s1325_s3 = scalar_lea.hbm %s2073_s9, 64 }
 0x217   : > { %p1322_p0 = scmp.ne.s32.totalorder %s1919_s27, %s1321_s28  ;;  %p1326_p8 = scmp.lt.u32.totalorder %s1919_s27, %s2073_s9 }
 0x218   : > { %p1327_p6 = scmp.lt.u32.totalorder %s1325_s3, %s1321_s28  ;;  %p1329_p2 = scmp.lt.u32.totalorder %s1321_s28, %s1919_s27 }
 0x219   : > { %p1323_p10 = pnand %p1322_p0, %p2070_p4 }
 0x21a   : > { %p1328_p1 = por %p1327_p6, %p1326_p8 }
 0x21b   : > { %p1324_p13 = pneg %p1323_p10 }
 0x21c   : > { %p1330_p9 = por %p1329_p2, %p1328_p1 }
 0x21e   : > { %p1331_p3 = pnand %p1330_p9, %p1324_p13 }
 0x220   : > { %1334 = shalt.err (!%p1331_p3)
}
 0x221   : > { %986 = dma.vmem_to_hbm [thread:$0]  (%p2070_p4), %s726_s24, 32, %s1919_s27, %s1861_s14  }
 0x222 PF: > { %s2074_s10 = sld [smem:[#allocation18_spill]]  ;;  %s2075_s18 = sld [smem:[#allocation25_spill]] }
 0x223   : > { %p1014_p5 = scmp.ge.s32.totalorder %s1465_s6, 2 }
 0x228   : > { %s737_s7 = sand.u32 1, %s2074_s10   ;;  %p2076_p7 = scmp.ne.s32.totalorder %s2075_s18, 0 }
 0x229   : > { %s738_s13 = scalar_lea.sflag [#allocation5], %s737_s7 }
 0x22a   : > { %p1002_p11 = pnand %p1014_p5, %p2076_p7 }
 0x22c   : > { %1404 = dma.done.wait (!%p1002_p11), %s738_s13, 1024  }
 0x22d   : > { %1406 = vsyncadd (!%p1002_p11), %s738_s13, 4294966272  ;;  %s2077_s21 = sadd.s32 4294967294, %s1465_s6  }
 0x22e   : > { %s746_s4 = sand.u32 1, %s2077_s21  }
 0x22f   : > { %s747_s12 = scalar_lea.sflag [#allocation11], %s746_s4 }
 0x230   : > { %1408 = dma.done.wait (!%p1002_p11), %s747_s12, 64  }
 0x231   : > { %1410 = vsyncadd (!%p1002_p11), %s747_s12, 4294967232  ;;  %s28_s6 = sadd.s32 1, %s1465_s6   ;;  %s2079_s18 = sld [smem:[#allocation19_spill]] }
 0x232   : > { %p1947_p4 = scmp.ge.s32.totalorder %s28_s6, 6   ;;  %s2080_s28 = sld [smem:[#allocation22_spill]] }
 0x233   : > { %s2081_s14 = sld [smem:[#allocation26_spill]]  ;;  %s2082_s30 = sld [smem:[#allocation27_spill]] }
 0x234   : > { %s2083_s19 = smov %s1421_s20  ;;  %s2084_s20 = smov %s1698_s8 }
 0x235   : > { %s2085_s21 = smov %s1429_s22  ;;  %s2086_s22 = smov %s1433_s23 }
 0x236   : > { %s2087_s23 = smov %s1686_s2  ;;  %s2088_s24 = smov %s1441_s25 }
 0x237   : > { %s2089_s25 = smov %s1445_s26  ;;  %s2090_s26 = smov %s1703_s5 }
 0x238   : > { %s2091_s27 = smov %s1457_s29  ;;  %27 = sbr.rel (!%p1947_p4) target bundleno = 21 (0x15), region = 134 }
 0x239   : > { %s2092_s29 = smov %s2081_s14 }
 0x23f   :  { %761 = vsyncpa [#allocation4], 1 }
 0x240   :  { %763 = vsyncpa [#allocation4 + $0x1], 1 }
 0x241   :  { %764 = vsyncpa [#allocation7], 1 }
 0x242   :  { %766 = vsyncpa [#allocation7 + $0x1], 1 }
 0x243   :  { %767 = vsyncpa [#allocation5], 1 }
 0x244   :  { %769 = vsyncpa [#allocation5 + $0x1], 1 }
 0x245   :  { %770 = vsyncpa [#allocation11], 1 }
 0x246   :  { %772 = vsyncpa [#allocation11 + $0x1], 1 }

// kernel: cell_encoder.3
= control target key start
LH: loop header
LB: loop body
LE: loop exit
PB: predicated region body
PF: predicated region fallthrough
CT: control target
= control target key end

     0   :  { %12 = vsyncpa [#allocation3], 0  ;;  %s1802_s0 = inlined_call_operand.hbm [shape: f32[64,256], index: 0, kind: input, shape index: {}]   ;;  %s1803_s1 = inlined_call_operand.hbm [shape: f32[1,256], index: 1, kind: input, shape index: {}]   ;;  %s1804_s2 = inlined_call_operand.hbm [shape: f32[1,256], index: 2, kind: input, shape index: {}]   ;;  %s1805_s3 = inlined_call_operand.hbm [shape: bf16[256,128], index: 3, kind: input, shape index: {}]   ;;  %s1806_s4 = inlined_call_operand.hbm [shape: f32[1,128], index: 4, kind: input, shape index: {}]   ;;  %s1807_s5 = inlined_call_operand.hbm [shape: bf16[128,128], index: 5, kind: input, shape index: {}]   ;;  %s1808_s6 = inlined_call_operand.hbm [shape: f32[1,128], index: 6, kind: input, shape index: {}]   ;;  %s1809_s7 = inlined_call_operand.hbm [shape: f32[64,128], index: 7, kind: output, shape index: {}]  }
   0x1   :  { %14 = vsyncpa [#allocation3 + $0x1], 0 }
   0x2   :  { %15 = vsyncpa [#allocation6], 0 }
   0x3   :  { %16 = vsyncpa [#allocation9], 0 }
   0x4   :  { %17 = vsyncpa [#allocation12], 0 }
   0x5   :  { %18 = vsyncpa [#allocation4], 0 }
   0x6   :  { %20 = vsyncpa [#allocation4 + $0x1], 0  ;;  %s1473_s24 = smov 0   ;;  %s1475_s25 = smov 0  }
   0x7   :  { %s1477_s26 = smov 0   ;;  %s1479_s27 = smov 0  }
   0x8 LB: > { %s1419_s28 = smov [#allocation5]   ;;  %s1494_s30 = sadd.s32 4294967295, %s1417_s27   ;;  %s1417_s27 = sphi %s1479_s27, %s1835_s27   ;;  %s1413_s26 = sphi %s1477_s26, %s1834_s26   ;;  %s1409_s25 = sphi %s1475_s25, %s1833_s25   ;;  %s1405_s24 = sphi %s1473_s24, %s1832_s24  }
   0x9   : > { %s222_s29 = sshll.u32 %s1419_s28, 4  ;;  %p891_p0 = scmp.ge.s32.totalorder %s1417_s27, 1  ;;  %s223_s29 = int_to_ptr.vmem [resolvable:$true] %s222_s29 }
   0xa   : > { %p1810_p1 = scmp.eq.s32.totalorder %s1494_s30, 0  ;;  %p209_p2 = scmp.lt.s32.totalorder %s1417_s27, 3 }
   0xb   : > { %s1420_s9 = smov [#allocation8]   ;;  %s1421_s12 = smov [#allocation11]  }
   0xc   : > { %p1499_p3 = pnand %p891_p0, %p209_p2  ;;  %s243_s10 = sshll.u32 %s1420_s9, 4  ;;  %s1506_s10 = int_to_ptr.vmem [resolvable:$true] %s243_s10 }
   0xd   : > { %s267_s13 = sshll.u32 %s1421_s12, 4  ;;  %s1141_s16 = scalar_lea.hbm %s1803_s1, 32  ;;  %s1514_s13 = int_to_ptr.vmem [resolvable:$true] %s267_s13 }
   0xe   : > { %s1813_s8 = scalar_select %p1499_p3, 1, 0 }
   0xf   : > { %p1032_p5 = pneg %p1499_p3  ;;  %p1142_p7 = scmp.ne.s32.totalorder %s1803_s1, %s1141_s16 }
  0x10   : > { %p1148_p11 = scmp.lt.u32.totalorder %s1141_s16, %s1803_s1 }
  0x11   : > { %p1510_p6 = pnand %p1032_p5, %p1810_p1 }
  0x13   : > { %p1524_p8 = pneg %p1510_p6 }
  0x15   : > { %p1144_p9 = pnand %p1524_p8, %p1142_p7 }
  0x17   : > { %p1145_p10 = pneg %p1144_p9 }
  0x19   : > { %p1150_p12 = pnand %p1148_p11, %p1145_p10 }
  0x1b   : > { %1153 = shalt.err (!%p1150_p12)
}
  0x1c   : > { %s1154_s22 = scalar_lea.vmem %s223_s29, 32  ;;  %p1162_p5 = scmp.lt.s32.totalorder %s223_s29, %s223_s29 }
  0x1d   : > { %p1155_p13 = scmp.ne.s32.totalorder %s223_s29, %s1154_s22  ;;  %p1163_p4 = scmp.lt.s32.totalorder %s1154_s22, %s1154_s22 }
  0x1f   : > { %p1157_p0 = pnand %p1155_p13, %p1524_p8  ;;  %p1164_p1 = por %p1163_p4, %p1162_p5 }
  0x21   : > { %p1158_p2 = pneg %p1157_p0 }
  0x23   : > { %p1165_p3 = pnand %p1164_p1, %p1158_p2 }
  0x25   : > { %1168 = shalt.err (!%p1165_p3)
}
  0x26   : > { %1035 = dma.hbm_to_vmem [thread:$0]  (!%p1510_p6), %s1803_s1, 32, %s223_s29, [#allocation6]  }
  0x27   : > { %s1169_s14 = scalar_lea.hbm %s1805_s3, 2048 }
  0x28   : > { %p1170_p7 = scmp.ne.s32.totalorder %s1805_s3, %s1169_s14  ;;  %p1176_p1 = scmp.lt.u32.totalorder %s1169_s14, %s1805_s3 }
  0x2a   : > { %p1172_p9 = pnand %p1170_p7, %p1524_p8 }
  0x2c   : > { %p1173_p4 = pneg %p1172_p9 }
  0x2e   : > { %p1178_p3 = pnand %p1176_p1, %p1173_p4 }
  0x30   : > { %1181 = shalt.err (!%p1178_p3)
}
  0x31   : > { %s1182_s29 = scalar_lea.vmem %s1506_s10, 2048  ;;  %p1190_p13 = scmp.lt.s32.totalorder %s1506_s10, %s1506_s10 }
  0x32   : > { %p1183_p10 = scmp.ne.s32.totalorder %s1506_s10, %s1182_s29  ;;  %p1191_p0 = scmp.lt.s32.totalorder %s1182_s29, %s1182_s29 }
  0x34   : > { %p1185_p11 = pnand %p1183_p10, %p1524_p8  ;;  %p1192_p2 = por %p1191_p0, %p1190_p13 }
  0x36   : > { %p1186_p12 = pneg %p1185_p11 }
  0x38   : > { %p1193_p5 = pnand %p1192_p2, %p1186_p12 }
  0x3a   : > { %1196 = shalt.err (!%p1193_p5)
}
  0x3b   : > { %s1422_s20 = smov 64   ;;  %s1423_s21 = smov 4  }
  0x3c   : > { %1041 = dma.hbm_to_vmem [thread:$0]  (!%p1510_p6), %s1805_s3, 2048, %s1506_s10, [#allocation9], %s1422_s20, %s1422_s20, %s1423_s21  }
  0x3d   : > { %s1197_s12 = scalar_lea.hbm %s1807_s5, 1024 }
  0x3e   : > { %p1198_p7 = scmp.ne.s32.totalorder %s1807_s5, %s1197_s12  ;;  %p1204_p1 = scmp.lt.u32.totalorder %s1197_s12, %s1807_s5 }
  0x40   : > { %p1200_p9 = pnand %p1198_p7, %p1524_p8 }
  0x42   : > { %p1201_p4 = pneg %p1200_p9 }
  0x44   : > { %p1206_p3 = pnand %p1204_p1, %p1201_p4 }
  0x46   : > { %1209 = shalt.err (!%p1206_p3)
}
  0x47   : > { %s1210_s10 = scalar_lea.vmem %s1514_s13, 1024  ;;  %p1218_p13 = scmp.lt.s32.totalorder %s1514_s13, %s1514_s13 }
  0x48   : > { %p1211_p10 = scmp.ne.s32.totalorder %s1514_s13, %s1210_s10  ;;  %p1219_p0 = scmp.lt.s32.totalorder %s1210_s10, %s1210_s10 }
  0x4a   : > { %p1213_p11 = pnand %p1211_p10, %p1524_p8  ;;  %p1220_p2 = por %p1219_p0, %p1218_p13 }
  0x4c   : > { %p1214_p12 = pneg %p1213_p11 }
  0x4e   : > { %p1221_p5 = pnand %p1220_p2, %p1214_p12 }
  0x50   : > { %1224 = shalt.err (!%p1221_p5)
}
  0x51   : > { %1047 = dma.hbm_to_vmem [thread:$0]  (!%p1510_p6), %s1807_s5, 1024, %s1514_s13, [#allocation12], %s1422_s20, %s1422_s20, %s1423_s21  }
  0x52   : > { %s1424_s22 = smov [#allocation7]   ;;  %s1425_s28 = smov [#allocation10]  }
  0x53   : > { %s233_s23 = sshll.u32 %s1424_s22, 4  ;;  %s257_s9 = sshll.u32 %s1425_s28, 4  ;;  %s234_s23 = int_to_ptr.vmem [resolvable:$true] %s233_s23  ;;  %s258_s9 = int_to_ptr.vmem [resolvable:$true] %s257_s9 }
  0x54   : > { %s1225_s15 = scalar_lea.hbm %s1804_s2, 32 }
  0x55   : > { %p1226_p7 = scmp.ne.s32.totalorder %s1804_s2, %s1225_s15  ;;  %p1232_p1 = scmp.lt.u32.totalorder %s1225_s15, %s1804_s2 }
  0x57   : > { %p1228_p9 = pnand %p1226_p7, %p1524_p8 }
  0x59   : > { %p1229_p4 = pneg %p1228_p9 }
  0x5b   : > { %p1234_p3 = pnand %p1232_p1, %p1229_p4 }
  0x5d   : > { %1237 = shalt.err (!%p1234_p3)
}
  0x5e   : > { %s1238_s13 = scalar_lea.vmem %s234_s23, 32  ;;  %p1246_p13 = scmp.lt.s32.totalorder %s234_s23, %s234_s23 }
  0x5f   : > { %p1239_p10 = scmp.ne.s32.totalorder %s234_s23, %s1238_s13  ;;  %p1247_p0 = scmp.lt.s32.totalorder %s1238_s13, %s1238_s13 }
  0x61   : > { %p1241_p11 = pnand %p1239_p10, %p1524_p8  ;;  %p1248_p2 = por %p1247_p0, %p1246_p13 }
  0x63   : > { %p1242_p12 = pneg %p1241_p11 }
  0x65   : > { %p1249_p5 = pnand %p1248_p2, %p1242_p12 }
  0x67   : > { %1252 = shalt.err (!%p1249_p5)
}
  0x68   : > { %1038 = dma.hbm_to_vmem [thread:$0]  (!%p1510_p6), %s1804_s2, 32, %s234_s23, [#allocation6]  }
  0x69   : > { %s1253_s28 = scalar_lea.hbm %s1806_s4, 16 }
  0x6a   : > { %p1254_p7 = scmp.ne.s32.totalorder %s1806_s4, %s1253_s28  ;;  %p1260_p1 = scmp.lt.u32.totalorder %s1253_s28, %s1806_s4 }
  0x6c   : > { %p1256_p9 = pnand %p1254_p7, %p1524_p8 }
  0x6e   : > { %p1257_p4 = pneg %p1256_p9 }
  0x70   : > { %p1262_p3 = pnand %p1260_p1, %p1257_p4 }
  0x72   : > { %1265 = shalt.err (!%p1262_p3)
}
  0x73   : > { %s1266_s17 = scalar_lea.vmem %s258_s9, 16  ;;  %s1273_s23 = scalar_lea.vmem %s258_s9, 32 }
  0x74   : > { %p1267_p10 = scmp.ne.s32.totalorder %s258_s9, %s1266_s17  ;;  %p1274_p13 = scmp.lt.s32.totalorder %s258_s9, %s258_s9 }
  0x75   : > { %p1275_p0 = scmp.lt.s32.totalorder %s1273_s23, %s1266_s17 }
  0x76   : > { %p1269_p11 = pnand %p1267_p10, %p1524_p8 }
  0x77   : > { %p1276_p2 = por %p1275_p0, %p1274_p13 }
  0x78   : > { %p1270_p12 = pneg %p1269_p11 }
  0x7a   : > { %p1277_p5 = pnand %p1276_p2, %p1270_p12 }
  0x7c   : > { %1280 = shalt.err (!%p1277_p5)
}
  0x7d   : > { %1044 = dma.hbm_to_vmem [thread:$0]  (!%p1510_p6), %s1806_s4, 16, %s258_s9, [#allocation9]  }
  0x7e   : > { %s1426_s13 = smov [#allocation13]   ;;  %s1281_s22 = scalar_lea.hbm %s1808_s6, 16 }
  0x7f   : > { %s281_s20 = sshll.u32 %s1426_s13, 4  ;;  %p1282_p7 = scmp.ne.s32.totalorder %s1808_s6, %s1281_s22  ;;  %s282_s20 = int_to_ptr.vmem [resolvable:$true] %s281_s20 }
  0x80   : > { %p1288_p1 = scmp.lt.u32.totalorder %s1281_s22, %s1808_s6 }
  0x81   : > { %p1284_p9 = pnand %p1282_p7, %p1524_p8 }
  0x83   : > { %p1285_p4 = pneg %p1284_p9 }
  0x85   : > { %p1290_p3 = pnand %p1288_p1, %p1285_p4 }
  0x87   : > { %1293 = shalt.err (!%p1290_p3)
}
  0x88   : > { %s1294_s9 = scalar_lea.vmem %s282_s20, 16  ;;  %s1301_s16 = scalar_lea.vmem %s282_s20, 32 }
  0x89   : > { %p1295_p10 = scmp.ne.s32.totalorder %s282_s20, %s1294_s9  ;;  %p1302_p13 = scmp.lt.s32.totalorder %s282_s20, %s282_s20 }
  0x8a   : > { %p1303_p0 = scmp.lt.s32.totalorder %s1301_s16, %s1294_s9 }
  0x8b   : > { %p1297_p11 = pnand %p1295_p10, %p1524_p8 }
  0x8c   : > { %p1304_p2 = por %p1303_p0, %p1302_p13 }
  0x8d   : > { %p1298_p12 = pneg %p1297_p11 }
  0x8f   : > { %p1305_p5 = pnand %p1304_p2, %p1298_p12 }
  0x91   : > { %1308 = shalt.err (!%p1305_p5)
}
  0x92   : > { %1050 = dma.hbm_to_vmem [thread:$0]  (!%p1510_p6), %s1808_s6, 16, %s282_s20, [#allocation12]  }
  0x93   : > { %s890_s19 = sadd.s32 4294967294, %s1417_s27   ;;  %s1642_s11 = sadd.s32 1, %s1417_s27  }
  0x94   : > { %s30_s10 = ssub.s32 %s1417_s27, %s1642_s11  ;;  %s33_s18 = sadd.s32 1, %s1413_s26 }
  0x95   : > { %p31_p8 = scmp.eq.s32.totalorder %s30_s10, 0  ;;  %p40_p7 = scmp.ne.s32.totalorder %s1413_s26, %s1409_s25 }
  0x96   : > { %p41_p9 = scmp.eq.s32.totalorder %s1417_s27, 0  ;;  %p46_p4 = scmp.ne.s32.totalorder %s1409_s25, %s1405_s24 }
  0x97   : > { %s1653_s13 = scalar_select %p31_p8, %s1413_s26, %s33_s18  }
  0x98   : > { %p1655_p1 = por %p41_p9, %p40_p7  ;;  %p1817_p3 = scmp.eq.s32.totalorder %s1494_s30, 0 }
  0x99   : > { %p196_p10 = scmp.eq.s32.totalorder %s1494_s30, 1  ;;  %p202_p11 = scmp.eq.s32.totalorder %s890_s19, 1 }
  0x9a   : > { %p1661_p6 = por %p1817_p3, %p46_p4  ;;  %p1065_p12 = scmp.lt.s32.totalorder %s1417_s27, 2 }
  0x9b   : > { %s292_s29 = sand.u32 1, %s1413_s26   ;;  %p1668_p13 = por %p196_p10, %p40_p7 }
  0x9c   : > { %p1672_p0 = por %p202_p11, %p46_p4  ;;  %s899_s12 = sshll.u32 %s292_s29, 6 }
  0x9d   : > { %s1819_s22 = scalar_select %p1668_p13, 1, 0 }
  0x9e   : > { %s1820_s28 = scalar_select %p1672_p0, 1, 0 }
  0x9f   : > { %s944_s14 = sshll.u32 %s1417_s27, 10  ;;  %s296_s17 = scalar_lea.vmem [#allocation2], %s899_s12 }
  0xa0   : > { %s1680_s16 = scalar_lea.hbm %s1802_s0, %s944_s14  ;;  %s304_s23 = sshll.u32 %s296_s17, 4  ;;  %s1682_s23 = int_to_ptr.vmem [resolvable:$true] %s304_s23 }
  0xa1   : > { %p1686_p2 = pnand %p1065_p12, %p1655_p1  ;;  %s1690_s10 = scalar_lea.sflag [#allocation3], %s292_s29 }
  0xa2   : > { %s1309_s18 = scalar_lea.hbm %s1680_s16, 1024  ;;  %s1314_s21 = scalar_lea.hbm %s1802_s0, 2048 }
  0xa3   : > { %p1310_p5 = scmp.ne.s32.totalorder %s1680_s16, %s1309_s18  ;;  %p1311_p8 = pneg %p1686_p2 }
  0xa4   : > { %p1315_p4 = scmp.lt.u32.totalorder %s1680_s16, %s1802_s0  ;;  %p1316_p1 = scmp.lt.u32.totalorder %s1314_s21, %s1309_s18 }
  0xa5   : > { %p1312_p7 = pnand %p1311_p8, %p1310_p5  ;;  %p1318_p10 = scmp.lt.u32.totalorder %s1309_s18, %s1680_s16 }
  0xa6   : > { %p1317_p3 = por %p1316_p1, %p1315_p4 }
  0xa7   : > { %p1313_p9 = pneg %p1312_p7 }
  0xa8   : > { %p1319_p11 = por %p1318_p10, %p1317_p3 }
  0xaa   : > { %p1320_p12 = pnand %p1319_p11, %p1313_p9 }
  0xac   : > { %1323 = shalt.err (!%p1320_p12)
}
  0xad   : > { %s1324_s29 = scalar_lea.vmem %s1682_s23, 1024  ;;  %s1427_s17 = smov [#allocation2]  }
  0xae   : > { %p1325_p5 = scmp.ne.s32.totalorder %s1682_s23, %s1324_s29  ;;  %s1329_s12 = sshll.u32 %s1427_s17, 4  ;;  %s1330_s12 = int_to_ptr.vmem [resolvable:$false] %s1329_s12 }
  0xaf   : > { %s1331_s14 = scalar_lea.vmem %s1330_s12, 2048  ;;  %p1332_p13 = scmp.lt.s32.totalorder %s1682_s23, %s1330_s12 }
  0xb0   : > { %p1327_p7 = pnand %p1325_p5, %p1311_p8  ;;  %p1333_p4 = scmp.lt.s32.totalorder %s1331_s14, %s1324_s29 }
  0xb2   : > { %p1328_p0 = pneg %p1327_p7  ;;  %p1334_p1 = por %p1333_p4, %p1332_p13 }
  0xb4   : > { %p1335_p3 = pnand %p1334_p1, %p1328_p0 }
  0xb6   : > { %1338 = shalt.err (!%p1335_p3)
}
  0xb7   : > { %s1428_s18 = smov 256   ;;  %s1429_s21 = smov 16  }
  0xb8   : > { %1054 = dma.hbm_to_vmem [thread:$0]  (!%p1686_p2), %s1680_s16, 1024, %s1682_s23, %s1690_s10, %s1428_s18, %s1428_s18, %s1429_s21  }
  0xb9   : > { %p1822_p8 = scmp.ne.s32.totalorder %s1813_s8, 0 }
  0xba   : > { %s1721_s15 = sand.u32 (!%p1822_p8), 1, %s1409_s25  }
  0xbb   : > { %316 = sbr.rel (%p1822_p8) target bundleno = 701 (0x2bd), region = 48  ;;  %s904_s9 = sshll.u32 (!%p1822_p8), %s1721_s15, 6 }
  0xbc   : > { %s319_s29 = scalar_lea.sflag (!%p1822_p8), [#allocation3], %s1721_s15  ;;  %s1725_s17 = scalar_lea.vmem (!%p1822_p8), [#allocation2], %s904_s9 }
  0xc2   : > { %1384 = dma.done.wait (%p1661_p6), %s319_s29, 1024  }
  0xc3   : > { %1386 = vsyncadd (%p1661_p6), %s319_s29, 4294966272  ;;  %p1823_p13 = scmp.eq.s32.totalorder %s1494_s30, 0 }
  0xc5   : > { %1388 = dma.done.wait (%p1823_p13), [#allocation6], 64   ;;  %p1824_p0 = pmov %p1823_p13 }
  0xc7   : > { %1390 = vsyncadd (%p1824_p0), [#allocation6], 4294967232  ;;  %p1825_p2 = pmov %p1824_p0 }
  0xc8   : > { %p1826_p9 = pmov %p1824_p0 }
  0xc9   : > { %1392 = dma.done.wait (%p1825_p2), [#allocation9], 2064  }
  0xca   : > { %1394 = vsyncadd (%p1826_p9), [#allocation9], 4294965232  ;;  %p1827_p10 = pmov %p1824_p0 }
  0xcb   : > { %p1828_p11 = pmov %p1824_p0 }
  0xcc   : > { %1396 = dma.done.wait (%p1827_p10), [#allocation12], 1040  }
  0xcd   : > { %1398 = vsyncadd (%p1828_p11), [#allocation12], 4294966256  ;;  %v1117_v0 = vld [vmem:[#allocation8 + $0x40] sm:$0xff]   ;;  %v1119_v2 = vld [vmem:[#allocation8 + $0x48] sm:$0xff]   ;;  %v390_v5 = vlaneseq  ;;  %s911_s8 = sshll.u32 %s1721_s15, 5  ;;  %s945_s23 = sshll.u32 %s1494_s30, 9 }
  0xce   : > { %v1118_v1 = vld [vmem:[#allocation8] sm:$0xff]   ;;  %946 = vmatprep.subr.bf16.mxu0 %v1117_v0  ;;  %v1120_v3 = vld [vmem:[#allocation8 + $0x8] sm:$0xff]   ;;  %v1121_v4 = vld [vmem:[#allocation8 + $0x50] sm:$0xff]   ;;  %s376_s20 = scalar_lea.vmem [#allocation14], %s911_s8  ;;  %s1758_s12 = scalar_lea.hbm %s1809_s7, %s945_s23 }
  0xcf   : > { %947 = vmatpush3.bf16.msra.mxu0 %v1118_v1  ;;  %v1122_v6 = vld [vmem:[#allocation8 + $0x10] sm:$0xff]   ;;  %v1123_v7 = vld [vmem:[#allocation8 + $0x58] sm:$0xff]   ;;  %v391_v8 = vshrl.u32 %v390_v5, 7  ;;  %v1125_v10 = vld [vmem:[#allocation8 + $0x60] sm:$0xff]   ;;  %s760_s16 = sshll.u32 %s376_s20, 4  ;;  %s747_s30 = scalar_lea.sflag [#allocation4], %s1721_s15  ;;  %s1753_s16 = int_to_ptr.vmem [resolvable:$true] %s760_s16 }
  0xd0   : > { %948 = vmatprep.subr.bf16.mxu0 %v1119_v2  ;;  %v1124_v9 = vld [vmem:[#allocation8 + $0x18] sm:$0xff]   ;;  %v1126_v12 = vld [vmem:[#allocation8 + $0x20] sm:$0xff]   ;;  %v1127_v14 = vld [vmem:[#allocation8 + $0x68] sm:$0xff]   ;;  %s1339_s14 = scalar_lea.vmem %s1753_s16, 512  ;;  %p1829_p12 = scmp.ne.s32.totalorder %s1819_s22, 0 }
  0xd1   : > { %v396_v11 = vsub.s32 1, %v391_v8  ;;  %v392_v13 = vsub.s32 0, %v391_v8  ;;  %v381_v15 = vld [vmem:[%s1725_s17 + $0x8] sm:$0xff]  ;;  %v383_v16 = vld [vmem:[%s1725_s17 + $0x18] sm:$0xff]  ;;  %v388_v17 = vld [vmem:[#allocation5] sm:$0x3]  ;;  %p1340_p6 = scmp.ne.s32.totalorder %s1753_s16, %s1339_s14 }
  0xd2   : > { %v1128_v18 = vld [vmem:[#allocation8 + $0x28] sm:$0xff]   ;;  %v408_v20 = vld [vmem:[#allocation7] sm:$0x3]  ;;  %v1129_v21 = vld [vmem:[#allocation8 + $0x70] sm:$0xff]   ;;  %s1430_s18 = smov [#allocation14]  }
  0xd3   : > { %949 = vmatpush3.bf16.msra.mxu0 %v1120_v3  ;;  %v397_v19 = vrot.slane %v388_v17, %v396_v11  ;;  %v393_v22 = vrot.slane %v388_v17, %v392_v13  ;;  %v417_v23 = vrot.slane %v408_v20, %v396_v11  ;;  %v380_v24 = vld [vmem:[%s1725_s17] sm:$0xff]  ;;  %v382_v25 = vld [vmem:[%s1725_s17 + $0x10] sm:$0xff]  ;;  %v385_v26 = vld [vmem:[%s1725_s17 + $0x28] sm:$0xff]  ;;  %v413_v36 = vrot.slane %v408_v20, %v392_v13  ;;  %p1341_p5 = pnand %p1340_p6, %p1829_p12  ;;  %s1343_s21 = sshll.u32 %s1430_s18, 4  ;;  %s1344_s21 = int_to_ptr.vmem [resolvable:$false] %s1343_s21 }
  0xd4   : > { %950 = vmatprep.subr.bf16.mxu0 %v1121_v4  ;;  %v387_v29 = vld [vmem:[%s1725_s17 + $0x38] sm:$0xff]  ;;  %v1133_v30 = vld [vmem:[#allocation11] sm:$0xff]   ;;  %v1134_v34 = vld [vmem:[#allocation11 + $0x8] sm:$0xff]   ;;  %s1345_s9 = scalar_lea.vmem %s1344_s21, 1024  ;;  %p1346_p4 = scmp.lt.s32.totalorder %s1753_s16, %s1344_s21 }
  0xd5   : > { %v401_v27 = vmul.f32 %v397_v19, %v381_v15  ;;  %v403_v28 = vmul.f32 %v397_v19, %v383_v16  ;;  %v1130_v31 = vld [vmem:[#allocation8 + $0x30] sm:$0xff]   ;;  %v1131_v35 = vld [vmem:[#allocation8 + $0x78] sm:$0xff]   ;;  %v400_v37 = vmul.f32 %v393_v22, %v380_v24  ;;  %v402_v38 = vmul.f32 %v393_v22, %v382_v25  ;;  %984 = vmatprep.subr.bf16.mxu1 %v1133_v30  ;;  %v1137_v58 = vld [vmem:[#allocation11 + $0x20] sm:$0xff]   ;;  %p1342_p7 = pneg %p1341_p5  ;;  %p1347_p1 = scmp.lt.s32.totalorder %s1345_s9, %s1339_s14 }
  0xd6   : > { %v1135_v39 = vld [vmem:[#allocation11 + $0x10] sm:$0xff]   ;;  %v405_v41 = vmul.f32 %v397_v19, %v385_v26  ;;  %v407_v42 = vmul.f32 %v397_v19, %v387_v29  ;;  %985 = vmatpush3.bf16.msra.mxu1 %v1133_v30  ;;  %v384_v48 = vld [vmem:[%s1725_s17 + $0x20] sm:$0xff]  ;;  %v1138_v59 = vld [vmem:[#allocation11 + $0x28] sm:$0xff]  }
  0xd7   : > { %951 = vmatpush3.bf16.msra.mxu0 %v1122_v6  ;;  %v421_v32 = vadd.f32 %v417_v23, %v401_v27  ;;  %v423_v33 = vadd.f32 %v417_v23, %v403_v28  ;;  %986 = vmatprep.subr.bf16.mxu1 %v1134_v34  ;;  %v420_v43 = vadd.f32 %v413_v36, %v400_v37  ;;  %v1132_v45 = vld [vmem:[#allocation8 + $0x38] sm:$0xff]   ;;  %v386_v49 = vld [vmem:[%s1725_s17 + $0x30] sm:$0xff]  ;;  %v912_v0 = vld [vmem:[#allocation10] ss:$0 sm:$0xff]  ;;  %p1348_p3 = por %p1347_p1, %p1346_p4 }
  0xd8   : > { %952 = vmatprep.subr.bf16.mxu0 %v1123_v7  ;;  %v422_v44 = vadd.f32 %v413_v36, %v402_v38  ;;  %v425_v46 = vadd.f32 %v417_v23, %v405_v41  ;;  %v427_v47 = vadd.f32 %v417_v23, %v407_v42  ;;  %v404_v51 = vmul.f32 %v393_v22, %v384_v48  ;;  %v1136_v57 = vld [vmem:[#allocation11 + $0x18] sm:$0xff]   ;;  %v1139_v60 = vld [vmem:[#allocation11 + $0x30] sm:$0xff]  }
  0xd9   : > { %v429_v40 = vpack.c.bf16 %v423_v33, %v421_v32  ;;  %v406_v52 = vmul.f32 %v393_v22, %v386_v49  ;;  %v1140_v61 = vld [vmem:[#allocation11 + $0x38] sm:$0xff]   ;;  %p1349_p8 = pnand %p1348_p3, %p1342_p7 }
  0xda   : > { %987 = vmatpush3.bf16.msra.mxu1 %v1134_v34  ;;  %v428_v50 = vpack.c.bf16 %v422_v44, %v420_v43  ;;  %v431_v53 = vpack.c.bf16 %v427_v47, %v425_v46  ;;  %v424_v54 = vadd.f32 %v413_v36, %v404_v51 }
  0xdb   : > { %953 = vmatpush3.bf16.msra.mxu0 %v1124_v9  ;;  %599 = vmatprep.mubr.bf16.mxu0 %v429_v40  ;;  %v426_v55 = vadd.f32 %v413_v36, %v406_v52 }
  0xdc   : > { %954 = vmatprep.subr.bf16.mxu0 %v1125_v10  ;;  %988 = vmatprep.subr.bf16.mxu1 %v1135_v39 }
  0xdd   : > { %v430_v56 = vpack.c.bf16 %v426_v55, %v424_v54 }
  0xde   : > { %989 = vmatpush3.bf16.msra.mxu1 %v1135_v39 }
  0xdf   : > { %955 = vmatpush3.bf16.msra.mxu0 %v1126_v12  ;;  %990 = vmatprep.subr.bf16.mxu1 %v1136_v57 }
  0xe0   : > { %956 = vmatprep.subr.bf16.mxu0 %v1127_v14 }
  0xe2   : > { %991 = vmatpush3.bf16.msra.mxu1 %v1136_v57 }
  0xe3   : > { %957 = vmatpush3.bf16.msra.mxu0 %v1128_v18  ;;  %992 = vmatprep.subr.bf16.mxu1 %v1137_v58 }
  0xe4   : > { %958 = vmatprep.subr.bf16.mxu0 %v1129_v21  ;;  %v929_v21 = vld [vmem:[#allocation13] ss:$0 sm:$0xff] }
  0xe6   : > { %993 = vmatpush3.bf16.msra.mxu1 %v1137_v58 }
  0xe7   : > { %959 = vmatpush3.bf16.msra.mxu0 %v1130_v31  ;;  %994 = vmatprep.subr.bf16.mxu1 %v1138_v59 }
  0xe8   : > { %960 = vmatprep.subr.bf16.mxu0 %v1131_v35 }
  0xea   : > { %995 = vmatpush3.bf16.msra.mxu1 %v1138_v59 }
  0xeb   : > { %961 = vmatpush3.bf16.msra.mxu0 %v1132_v45  ;;  %996 = vmatprep.subr.bf16.mxu1 %v1139_v60 }
  0xee   : > { %600 = vmatmul.mubr.bf16.vlgmr.msra.gmra.mrb[0].mxu0 %v428_v50  ;;  %997 = vmatpush3.bf16.msra.mxu1 %v1139_v60 }
  0xef   : > { %607 = vmatprep.mubr.bf16.mxu0 %v431_v53  ;;  %998 = vmatprep.subr.bf16.mxu1 %v1140_v61 }
  0xf2   : > { %999 = vmatpush3.bf16.msra.mxu1 %v1140_v61 }
  0xf6   : > { %608 = vmatmul.mubr.bf16.gmra.mrb[4].mxu0 %v430_v56 }
 0x1c1   : > { %v962_v62 = vpop.f32.mrb[0].mxu0 }
 0x1c2   : > { %v963_v63 = vpop.f32.mrb[1].mxu0 }
 0x1c3   : > { %v964_v1 = vadd.f32 %v963_v63, %v962_v62  ;;  %v965_v2 = vpop.f32.mrb[2].mxu0 }
 0x1c4   : > { %v966_v3 = vpop.f32.mrb[3].mxu0 }
 0x1c5   : > { %v967_v4 = vadd.f32 %v966_v3, %v965_v2  ;;  %v602_v5 = vadd.f32 %v964_v1, %v912_v0 }
 0x1c7   : > { %v605_v6 = vadd.f32 %v967_v4, %v912_v0  ;;  %v616_v8 = vmax.f32 %v602_v5, 0.0 }
 0x1c9   : > { %v968_v7 = vpop.f32.mrb[4].mxu0  ;;  %v617_v9 = vmax.f32 %v605_v6, 0.0 }
 0x1ca   : > { %v969_v10 = vpop.f32.mrb[5].mxu0 }
 0x1cb   : > { %v970_v11 = vadd.f32 %v969_v10, %v968_v7  ;;  %v971_v12 = vpop.f32.mrb[6].mxu0  ;;  %v620_v13 = vpack.c.bf16 %v617_v9, %v616_v8 }
 0x1cc   : > { %v972_v14 = vpop.f32.mrb[7].mxu0 }
 0x1cd   : > { %v610_v15 = vadd.f32 %v970_v11, %v912_v0  ;;  %v973_v16 = vadd.f32 %v972_v14, %v971_v12  ;;  %1000 = vmatprep.mubr.bf16.mxu1 %v620_v13 }
 0x1cf   : > { %v613_v17 = vadd.f32 %v973_v16, %v912_v0  ;;  %v618_v18 = vmax.f32 %v610_v15, 0.0 }
 0x1d1   : > { %v619_v19 = vmax.f32 %v613_v17, 0.0 }
 0x1d3   : > { %v621_v20 = vpack.c.bf16 %v619_v19, %v618_v18 }
 0x1d5   : > { %1001 = vmatmul.mubr.bf16.vlgmr.msra.gmra.mrb[0].mxu1 %v621_v20 }
 0x2a8   : > { %v1002_v22 = vpop.f32.mrb[0].mxu1 }
 0x2a9   : > { %v736_v23 = vadd.f32 %v1002_v22, %v929_v21  ;;  %v727_v24 = vpop.f32.mrb[1].mxu1 }
 0x2aa   : > { %v728_v25 = vadd.f32 %v929_v21, %v727_v24  ;;  %v1003_v26 = vpop.f32.mrb[2].mxu1 }
 0x2ab   : > { %744 = vst [vmem:[%s376_s20 + $0x10] sm:$0xff] %v736_v23  ;;  %v739_v27 = vadd.f32 %v1003_v26, %v929_v21  ;;  %v730_v28 = vpop.f32.mrb[3].mxu1 }
 0x2ac   : > { %742 = vst [vmem:[%s376_s20] sm:$0xff] %v728_v25  ;;  %v731_v29 = vadd.f32 %v929_v21, %v730_v28 }
 0x2ad   : > { %745 = vst [vmem:[%s376_s20 + $0x18] sm:$0xff] %v739_v27 }
 0x2ae   : > { %743 = vst [vmem:[%s376_s20 + $0x8] sm:$0xff] %v731_v29 }
 0x2af   : > { %1352 = shalt.err (!%p1349_p8)
}
 0x2b0   : > { %s1353_s29 = scalar_lea.hbm %s1758_s12, 512  ;;  %s1357_s20 = scalar_lea.hbm %s1809_s7, 1024 }
 0x2b1   : > { %p1354_p13 = scmp.ne.s32.totalorder %s1758_s12, %s1353_s29  ;;  %p1358_p9 = scmp.lt.u32.totalorder %s1758_s12, %s1809_s7 }
 0x2b2   : > { %p1359_p10 = scmp.lt.u32.totalorder %s1357_s20, %s1353_s29  ;;  %p1361_p6 = scmp.lt.u32.totalorder %s1353_s29, %s1758_s12 }
 0x2b3   : > { %p1355_p0 = pnand %p1354_p13, %p1829_p12 }
 0x2b4   : > { %p1360_p11 = por %p1359_p10, %p1358_p9 }
 0x2b5   : > { %p1356_p2 = pneg %p1355_p0 }
 0x2b6   : > { %p1362_p5 = por %p1361_p6, %p1360_p11 }
 0x2b8   : > { %p1363_p7 = pnand %p1362_p5, %p1356_p2 }
 0x2ba   : > { %1366 = shalt.err (!%p1363_p7)
}
 0x2bb   : > { %s1431_s10 = smov 128   ;;  %s1432_s14 = smov 8  }
 0x2bc   : > { %1030 = dma.vmem_to_hbm [thread:$0]  (%p1829_p12), %s1753_s16, 512, %s1758_s12, %s747_s30, %s1431_s10, %s1431_s10, %s1432_s14  }
 0x2bd PF: > { %s775_s18 = sand.u32 1, %s1405_s24   ;;  %p1830_p4 = scmp.ne.s32.totalorder %s1820_s28, 0 }
 0x2be   : > { %p1831_p1 = scmp.ge.s32.totalorder %s1417_s27, 2  ;;  %s776_s21 = scalar_lea.sflag [#allocation4], %s775_s18 }
 0x2c0   : > { %p1056_p3 = pnand %p1831_p1, %p1830_p4 }
 0x2c2   : > { %1400 = dma.done.wait (!%p1056_p3), %s776_s21, 512  }
 0x2c3   : > { %1402 = vsyncadd (!%p1056_p3), %s776_s21, 4294966784  ;;  %p23_p8 = scmp.ge.s32.totalorder %s1642_s11, 4   ;;  %s1832_s24 = smov %s1409_s25 }
 0x2c4   : > { %s1833_s25 = smov %s1413_s26  ;;  %s1834_s26 = smov %s1653_s13 }
 0x2c5   : > { %s1835_s27 = smov %s1642_s11  ;;  %25 = sbr.rel (!%p23_p8) target bundleno = 8 (0x8), region = 117 }
 0x2cc   :  { %781 = vsyncpa [#allocation3], 1 }
 0x2cd   :  { %783 = vsyncpa [#allocation3 + $0x1], 1 }
 0x2ce   :  { %784 = vsyncpa [#allocation6], 1 }
 0x2cf   :  { %785 = vsyncpa [#allocation9], 1 }
 0x2d0   :  { %786 = vsyncpa [#allocation12], 1 }
 0x2d1   :  { %787 = vsyncpa [#allocation4], 1 }
 0x2d2   :  { %789 = vsyncpa [#allocation4 + $0x1], 1 }

</bundles_post_ra>
